<compile_context>
chip_gen: v7x
topology: tpu7x:2x2x1
jax: 0.10.0
libtpu: 0.0.40
codegen_flags: <defaults>
</compile_context>

<pallas_src>
import functools

import jax
import jax.numpy as jnp
from jax import lax
from jax.experimental import pallas as pl
from jax.experimental.pallas import tpu as pltpu


def _encoder_kernel(*refs, num_layers, seq_len, batch, hidden):
    """Whole encoder in one kernel invocation.

    Ref layout (in order):
      inputs : pregates0 (T*B, 4H), W_hh0^T (H, 4H),
               then per layer l>0: W_ih_l^T (H, 4H), W_hh_l^T (H, 4H), bias_l (1, 4H)
      outputs: out (T*B, H), h_n (L, B, H), c_n (L, B, H)
      scratch: seq (T*B, H) f32, pregates (T*B, 4H) f32
    """
    T, B, H = seq_len, batch, hidden
    n_in = 2 + 3 * (num_layers - 1)
    in_refs = refs[:n_in]
    out_ref, hn_ref, cn_ref = refs[n_in:n_in + 3]
    seq_scr, pg_scr = refs[n_in + 3:]

    pregates0_ref = in_refs[0]
    whh_refs = [in_refs[1]]
    wih_refs = [None]
    b_refs = [None]
    for l in range(1, num_layers):
        base = 2 + 3 * (l - 1)
        wih_refs.append(in_refs[base])
        whh_refs.append(in_refs[base + 1])
        b_refs.append(in_refs[base + 2])

    def run_layer(pg_ref, whh_ref, seq_out_ref, layer):
        """Serial recurrence for one layer. pg_ref already holds x_t @ W_ih^T + bias."""
        whh = whh_ref[...]                                        # (H, 4H)

        def step(t, carry):
            h, c = carry
            row = t * B
            pre = pg_ref[pl.ds(row, B), :]                        # (B, 4H)
            gates = pre + jnp.dot(h, whh, preferred_element_type=jnp.float32)
            # Two full-vreg EUP launches (sigmoid / tanh of the whole gate block),
            # sliced afterwards, instead of four 32-lane-sliced launches.
            sig = jax.nn.sigmoid(gates)
            th = jnp.tanh(gates)
            i_g = sig[:, 0 * H:1 * H]
            f_g = sig[:, 1 * H:2 * H]
            g_g = th[:, 2 * H:3 * H]
            o_g = sig[:, 3 * H:4 * H]
            c_new = f_g * c + i_g * g_g
            h_new = o_g * jnp.tanh(c_new)
            seq_out_ref[pl.ds(row, B), :] = h_new.astype(seq_out_ref.dtype)
            return h_new, c_new

        init = (jnp.zeros((B, H), jnp.float32), jnp.zeros((B, H), jnp.float32))
        h_f, c_f = lax.fori_loop(0, T, step, init, unroll=True)
        hn_ref[layer] = h_f.astype(hn_ref.dtype)
        cn_ref[layer] = c_f.astype(cn_ref.dtype)

    last = num_layers - 1
    # Layer 0: pregates were hoisted out of the kernel (plain XLA matmul in the wrapper).
    run_layer(pregates0_ref, whh_refs[0], out_ref if last == 0 else seq_scr, 0)

    for l in range(1, num_layers):
        # Hoisted input projection for layer l: ONE (T*B, H) @ (H, 4H) MXU matmul over the
        # previous layer's full sequence (kept in VMEM), removed from the serial h-chain.
        pg = (jnp.dot(seq_scr[...], wih_refs[l][...],
                      preferred_element_type=jnp.float32)
              + b_refs[l][...])
        pg_scr[...] = pg
        run_layer(pg_scr, whh_refs[l], out_ref if l == last else seq_scr, l)


def encoder_forward(source_btd, params):
    """Equivalent of Encoder.forward: returns (outputs, (h_n, c_n)).

    source_btd: (B, T, input_dim)  (batch_first, like PyTorch)
    outputs:    (B, T, hidden_dim)
    h_n, c_n:   (num_layers, B, hidden_dim)
    """
    B, T, D = source_btd.shape
    H = params[0]["w_hh"].shape[1]
    L = len(params)

    # Time-major, flattened (T*B, D); hoisted layer-0 input projection as one XLA matmul.
    x_flat = jnp.transpose(source_btd, (1, 0, 2)).reshape(T * B, D).astype(jnp.float32)
    p0 = params[0]
    pregates0 = (x_flat @ jnp.asarray(p0["w_ih"].T, jnp.float32)
                 + jnp.asarray(p0["b_ih"] + p0["b_hh"], jnp.float32))      # (T*B, 4H)

    inputs = [pregates0, jnp.asarray(p0["w_hh"].T, jnp.float32)]
    in_specs = [
        pl.BlockSpec((T * B, 4 * H), lambda i: (0, 0)),
        pl.BlockSpec((H, 4 * H), lambda i: (0, 0)),
    ]
    for p in params[1:]:
        inputs += [
            jnp.asarray(p["w_ih"].T, jnp.float32),                         # (H, 4H)
            jnp.asarray(p["w_hh"].T, jnp.float32),                         # (H, 4H)
            jnp.asarray((p["b_ih"] + p["b_hh"])[None, :], jnp.float32),    # (1, 4H)
        ]
        in_specs += [
            pl.BlockSpec((H, 4 * H), lambda i: (0, 0)),
            pl.BlockSpec((H, 4 * H), lambda i: (0, 0)),
            pl.BlockSpec((1, 4 * H), lambda i: (0, 0)),
        ]

    kernel = functools.partial(_encoder_kernel, num_layers=L,
                               seq_len=T, batch=B, hidden=H)

    out_flat, h_n, c_n = pl.pallas_call(
        kernel,
        out_shape=(
            jax.ShapeDtypeStruct((T * B, H), jnp.float32),
            jax.ShapeDtypeStruct((L, B, H), jnp.float32),
            jax.ShapeDtypeStruct((L, B, H), jnp.float32),
        ),
        grid=(1,),
        in_specs=in_specs,
        out_specs=(
            pl.BlockSpec((T * B, H), lambda i: (0, 0)),
            pl.BlockSpec((L, B, H), lambda i: (0, 0, 0)),
            pl.BlockSpec((L, B, H), lambda i: (0, 0, 0)),
        ),
        scratch_shapes=[
            pltpu.VMEM((T * B, H), jnp.float32),       # previous-layer sequence (stays in VMEM)
            pltpu.VMEM((T * B, 4 * H), jnp.float32),   # hoisted pregates for layers > 0
        ],
        compiler_params=pltpu.CompilerParams(
            dimension_semantics=("arbitrary",)),
    )(*inputs)

    outputs = jnp.transpose(out_flat.reshape(T, B, H), (1, 0, 2))          # (B, T, H)
    return outputs, (h_n, c_n)


def init_encoder_params(key, input_dim, hidden_dim, num_layers):
    """Deterministic init matching nn.LSTM parameter shapes (uniform(-k, k), k=1/sqrt(H))."""
    k = 1.0 / jnp.sqrt(jnp.float32(hidden_dim))
    params = []
    for layer in range(num_layers):
        d_in = input_dim if layer == 0 else hidden_dim
        key, k1, k2, k3, k4 = jax.random.split(key, 5)
        params.append(dict(
            w_ih=jax.random.uniform(k1, (4 * hidden_dim, d_in), jnp.float32, -k, k),
            w_hh=jax.random.uniform(k2, (4 * hidden_dim, hidden_dim), jnp.float32, -k, k),
            b_ih=jax.random.uniform(k3, (4 * hidden_dim,), jnp.float32, -k, k),
            b_hh=jax.random.uniform(k4, (4 * hidden_dim,), jnp.float32, -k, k),
        ))
    return params


def _reference_forward(source_btd, params):
    """Pure-JAX reference (lax.scan) for sanity checking."""
    x = jnp.transpose(source_btd, (1, 0, 2))
    hs, cs = [], []
    for p in params:
        H = p["w_hh"].shape[1]
        wih_t, whh_t = p["w_ih"].T, p["w_hh"].T
        b = p["b_ih"] + p["b_hh"]

        def step(carry, x_t):
            h, c = carry
            g = x_t @ wih_t + h @ whh_t + b
            i = jax.nn.sigmoid(g[:, 0 * H:1 * H])
            f = jax.nn.sigmoid(g[:, 1 * H:2 * H])
            gg = jnp.tanh(g[:, 2 * H:3 * H])
            o = jax.nn.sigmoid(g[:, 3 * H:4 * H])
            c = f * c + i * gg
            h = o * jnp.tanh(c)
            return (h, c), h

        B = x.shape[1]
        (h, c), ys = jax.lax.scan(step, (jnp.zeros((B, H)), jnp.zeros((B, H))), x)
        x = ys
        hs.append(h)
        cs.append(c)
    return jnp.transpose(x, (1, 0, 2)), (jnp.stack(hs, 0), jnp.stack(cs, 0))


if __name__ == "__main__":
    # Small shapes consistent with the module: Encoder(input_dim=4, hidden_dim=32, num_layers=2)
    B, T, input_dim, hidden_dim, num_layers = 2, 8, 4, 32, 2

    key = jax.random.PRNGKey(0)
    key, pkey, xkey = jax.random.split(key, 3)
    params = init_encoder_params(pkey, input_dim, hidden_dim, num_layers)
    source = jax.random.normal(xkey, (B, T, input_dim), jnp.float32)

    outputs, (h_n, c_n) = encoder_forward(source, params)
    jax.block_until_ready((outputs, h_n, c_n))

    # Sanity check against a pure-JAX reference implementation.
    ref_out, (ref_h, ref_c) = _reference_forward(source, params)
    assert outputs.shape == (B, T, hidden_dim)
    assert h_n.shape == (num_layers, B, hidden_dim)
    assert c_n.shape == (num_layers, B, hidden_dim)
    assert jnp.allclose(outputs, ref_out, atol=1e-5)
    assert jnp.allclose(h_n, ref_h, atol=1e-5)
    assert jnp.allclose(c_n, ref_c, atol=1e-5)

    print("KERNEL_OK")
</pallas_src>

<mosaic_0001>
module attributes {stable_mosaic.version = 11 : i64} {
  func.func @_encoder_kernel(%arg0: i32, %arg1: memref<16x128xf32, #tpu.memory_space<vmem>>, %arg2: memref<32x128xf32, #tpu.memory_space<vmem>>, %arg3: memref<32x128xf32, #tpu.memory_space<vmem>>, %arg4: memref<32x128xf32, #tpu.memory_space<vmem>>, %arg5: memref<1x128xf32, #tpu.memory_space<vmem>>, %arg6: memref<16x32xf32, #tpu.memory_space<vmem>>, %arg7: memref<2x2x32xf32, #tpu.memory_space<vmem>>, %arg8: memref<2x2x32xf32, #tpu.memory_space<vmem>>, %arg9: memref<16x32xf32, #tpu.memory_space<vmem>>, %arg10: memref<16x128xf32, #tpu.memory_space<vmem>>) attributes {dimension_semantics = [#tpu.dimension_semantics<arbitrary>], iteration_bounds = array<i64: 1>, scalar_prefetch = 0 : i64, scratch_operands = 2 : i64, tpu.core_type = #tpu.core_type<tc>, window_params = [{pipeline_mode = #tpu.pipeline_mode<synchronous>, transform_indices = @transform_0, window_bounds = array<i64: 16, 128>}, {pipeline_mode = #tpu.pipeline_mode<synchronous>, transform_indices = @transform_1, window_bounds = array<i64: 32, 128>}, {pipeline_mode = #tpu.pipeline_mode<synchronous>, transform_indices = @transform_2, window_bounds = array<i64: 32, 128>}, {pipeline_mode = #tpu.pipeline_mode<synchronous>, transform_indices = @transform_3, window_bounds = array<i64: 32, 128>}, {pipeline_mode = #tpu.pipeline_mode<synchronous>, transform_indices = @transform_4, window_bounds = array<i64: 1, 128>}, {pipeline_mode = #tpu.pipeline_mode<synchronous>, transform_indices = @transform_5, window_bounds = array<i64: 16, 32>}, {pipeline_mode = #tpu.pipeline_mode<synchronous>, transform_indices = @transform_6, window_bounds = array<i64: 2, 2, 32>}, {pipeline_mode = #tpu.pipeline_mode<synchronous>, transform_indices = @transform_7, window_bounds = array<i64: 2, 2, 32>}]} {
    %c0 = arith.constant 0 : index
    %c0_0 = arith.constant 0 : index
    %0 = vector.load %arg2[%c0, %c0_0] : memref<32x128xf32, #tpu.memory_space<vmem>>, vector<32x128xf32>
    %cst = arith.constant 0.000000e+00 : f32
    %1 = vector.broadcast %cst : f32 to vector<2x32xf32>
    %cst_1 = arith.constant 0.000000e+00 : f32
    %2 = vector.broadcast %cst_1 : f32 to vector<2x32xf32>
    %c0_i32 = arith.constant 0 : i32
    %c2_i32 = arith.constant 2 : i32
    %3 = arith.muli %c0_i32, %c2_i32 : i32
    %4 = arith.index_cast %3 : i32 to index
    %c0_2 = arith.constant 0 : index
    %5 = vector.load %arg1[%4, %c0_2] : memref<16x128xf32, #tpu.memory_space<vmem>>, vector<2x128xf32>
    %cst_3 = arith.constant dense<0.000000e+00> : vector<2x128xf32>
    %6 = tpu.matmul %1, %0, %cst_3 {dimension_numbers = #tpu.dot_dimension_numbers<[1], [0], [0], [1], [0, 0, 1, 1], [], []>} : vector<2x32xf32>, vector<32x128xf32>, vector<2x128xf32> -> vector<2x128xf32>
    %7 = arith.addf %5, %6 : vector<2x128xf32>
    %8 = arith.negf %7 : vector<2x128xf32>
    %9 = math.exp %8 : vector<2x128xf32>
    %cst_4 = arith.constant 1.000000e+00 : f32
    %10 = vector.broadcast %cst_4 : f32 to vector<2x128xf32>
    %11 = arith.addf %10, %9 : vector<2x128xf32>
    %12 = arith.divf %10, %11 : vector<2x128xf32>
    %13 = math.tanh %7 : vector<2x128xf32>
    %14 = vector.extract_strided_slice %12 {offsets = [0, 0], sizes = [2, 32], strides = [1, 1]} : vector<2x128xf32> to vector<2x32xf32>
    %15 = vector.extract_strided_slice %12 {offsets = [0, 32], sizes = [2, 32], strides = [1, 1]} : vector<2x128xf32> to vector<2x32xf32>
    %16 = vector.extract_strided_slice %13 {offsets = [0, 64], sizes = [2, 32], strides = [1, 1]} : vector<2x128xf32> to vector<2x32xf32>
    %17 = vector.extract_strided_slice %12 {offsets = [0, 96], sizes = [2, 32], strides = [1, 1]} : vector<2x128xf32> to vector<2x32xf32>
    %18 = arith.mulf %15, %2 : vector<2x32xf32>
    %19 = arith.mulf %14, %16 : vector<2x32xf32>
    %20 = arith.addf %18, %19 : vector<2x32xf32>
    %21 = math.tanh %20 : vector<2x32xf32>
    %22 = arith.mulf %17, %21 : vector<2x32xf32>
    %23 = arith.index_cast %3 : i32 to index
    %c0_5 = arith.constant 0 : index
    %24 = vector.load %arg9[%23, %c0_5] : memref<16x32xf32, #tpu.memory_space<vmem>>, vector<2x32xf32>
    tpu.vector_store %arg9[%23, %c0_5], %22 {strides = array<i32>} : memref<16x32xf32, #tpu.memory_space<vmem>>, vector<2x32xf32>,
    %c1_i32 = arith.constant 1 : i32
    %c2_i32_6 = arith.constant 2 : i32
    %25 = arith.muli %c1_i32, %c2_i32_6 : i32
    %26 = arith.index_cast %25 : i32 to index
    %c0_7 = arith.constant 0 : index
    %27 = vector.load %arg1[%26, %c0_7] : memref<16x128xf32, #tpu.memory_space<vmem>>, vector<2x128xf32>
    %cst_8 = arith.constant dense<0.000000e+00> : vector<2x128xf32>
    %28 = tpu.matmul %22, %0, %cst_8 {dimension_numbers = #tpu.dot_dimension_numbers<[1], [0], [0], [1], [0, 0, 1, 1], [], []>} : vector<2x32xf32>, vector<32x128xf32>, vector<2x128xf32> -> vector<2x128xf32>
    %29 = arith.addf %27, %28 : vector<2x128xf32>
    %30 = arith.negf %29 : vector<2x128xf32>
    %31 = math.exp %30 : vector<2x128xf32>
    %cst_9 = arith.constant 1.000000e+00 : f32
    %32 = vector.broadcast %cst_9 : f32 to vector<2x128xf32>
    %33 = arith.addf %32, %31 : vector<2x128xf32>
    %34 = arith.divf %32, %33 : vector<2x128xf32>
    %35 = math.tanh %29 : vector<2x128xf32>
    %36 = vector.extract_strided_slice %34 {offsets = [0, 0], sizes = [2, 32], strides = [1, 1]} : vector<2x128xf32> to vector<2x32xf32>
    %37 = vector.extract_strided_slice %34 {offsets = [0, 32], sizes = [2, 32], strides = [1, 1]} : vector<2x128xf32> to vector<2x32xf32>
    %38 = vector.extract_strided_slice %35 {offsets = [0, 64], sizes = [2, 32], strides = [1, 1]} : vector<2x128xf32> to vector<2x32xf32>
    %39 = vector.extract_strided_slice %34 {offsets = [0, 96], sizes = [2, 32], strides = [1, 1]} : vector<2x128xf32> to vector<2x32xf32>
    %40 = arith.mulf %37, %20 : vector<2x32xf32>
    %41 = arith.mulf %36, %38 : vector<2x32xf32>
    %42 = arith.addf %40, %41 : vector<2x32xf32>
    %43 = math.tanh %42 : vector<2x32xf32>
    %44 = arith.mulf %39, %43 : vector<2x32xf32>
    %45 = arith.index_cast %25 : i32 to index
    %c0_10 = arith.constant 0 : index
    %46 = vector.load %arg9[%45, %c0_10] : memref<16x32xf32, #tpu.memory_space<vmem>>, vector<2x32xf32>
    tpu.vector_store %arg9[%45, %c0_10], %44 {strides = array<i32>} : memref<16x32xf32, #tpu.memory_space<vmem>>, vector<2x32xf32>,
    %c2_i32_11 = arith.constant 2 : i32
    %c2_i32_12 = arith.constant 2 : i32
    %47 = arith.muli %c2_i32_11, %c2_i32_12 : i32
    %48 = arith.index_cast %47 : i32 to index
    %c0_13 = arith.constant 0 : index
    %49 = vector.load %arg1[%48, %c0_13] : memref<16x128xf32, #tpu.memory_space<vmem>>, vector<2x128xf32>
    %cst_14 = arith.constant dense<0.000000e+00> : vector<2x128xf32>
    %50 = tpu.matmul %44, %0, %cst_14 {dimension_numbers = #tpu.dot_dimension_numbers<[1], [0], [0], [1], [0, 0, 1, 1], [], []>} : vector<2x32xf32>, vector<32x128xf32>, vector<2x128xf32> -> vector<2x128xf32>
    %51 = arith.addf %49, %50 : vector<2x128xf32>
    %52 = arith.negf %51 : vector<2x128xf32>
    %53 = math.exp %52 : vector<2x128xf32>
    %cst_15 = arith.constant 1.000000e+00 : f32
    %54 = vector.broadcast %cst_15 : f32 to vector<2x128xf32>
    %55 = arith.addf %54, %53 : vector<2x128xf32>
    %56 = arith.divf %54, %55 : vector<2x128xf32>
    %57 = math.tanh %51 : vector<2x128xf32>
    %58 = vector.extract_strided_slice %56 {offsets = [0, 0], sizes = [2, 32], strides = [1, 1]} : vector<2x128xf32> to vector<2x32xf32>
    %59 = vector.extract_strided_slice %56 {offsets = [0, 32], sizes = [2, 32], strides = [1, 1]} : vector<2x128xf32> to vector<2x32xf32>
    %60 = vector.extract_strided_slice %57 {offsets = [0, 64], sizes = [2, 32], strides = [1, 1]} : vector<2x128xf32> to vector<2x32xf32>
    %61 = vector.extract_strided_slice %56 {offsets = [0, 96], sizes = [2, 32], strides = [1, 1]} : vector<2x128xf32> to vector<2x32xf32>
    %62 = arith.mulf %59, %42 : vector<2x32xf32>
    %63 = arith.mulf %58, %60 : vector<2x32xf32>
    %64 = arith.addf %62, %63 : vector<2x32xf32>
    %65 = math.tanh %64 : vector<2x32xf32>
    %66 = arith.mulf %61, %65 : vector<2x32xf32>
    %67 = arith.index_cast %47 : i32 to index
    %c0_16 = arith.constant 0 : index
    %68 = vector.load %arg9[%67, %c0_16] : memref<16x32xf32, #tpu.memory_space<vmem>>, vector<2x32xf32>
    tpu.vector_store %arg9[%67, %c0_16], %66 {strides = array<i32>} : memref<16x32xf32, #tpu.memory_space<vmem>>, vector<2x32xf32>,
    %c3_i32 = arith.constant 3 : i32
    %c2_i32_17 = arith.constant 2 : i32
    %69 = arith.muli %c3_i32, %c2_i32_17 : i32
    %70 = arith.index_cast %69 : i32 to index
    %c0_18 = arith.constant 0 : index
    %71 = vector.load %arg1[%70, %c0_18] : memref<16x128xf32, #tpu.memory_space<vmem>>, vector<2x128xf32>
    %cst_19 = arith.constant dense<0.000000e+00> : vector<2x128xf32>
    %72 = tpu.matmul %66, %0, %cst_19 {dimension_numbers = #tpu.dot_dimension_numbers<[1], [0], [0], [1], [0, 0, 1, 1], [], []>} : vector<2x32xf32>, vector<32x128xf32>, vector<2x128xf32> -> vector<2x128xf32>
    %73 = arith.addf %71, %72 : vector<2x128xf32>
    %74 = arith.negf %73 : vector<2x128xf32>
    %75 = math.exp %74 : vector<2x128xf32>
    %cst_20 = arith.constant 1.000000e+00 : f32
    %76 = vector.broadcast %cst_20 : f32 to vector<2x128xf32>
    %77 = arith.addf %76, %75 : vector<2x128xf32>
    %78 = arith.divf %76, %77 : vector<2x128xf32>
    %79 = math.tanh %73 : vector<2x128xf32>
    %80 = vector.extract_strided_slice %78 {offsets = [0, 0], sizes = [2, 32], strides = [1, 1]} : vector<2x128xf32> to vector<2x32xf32>
    %81 = vector.extract_strided_slice %78 {offsets = [0, 32], sizes = [2, 32], strides = [1, 1]} : vector<2x128xf32> to vector<2x32xf32>
    %82 = vector.extract_strided_slice %79 {offsets = [0, 64], sizes = [2, 32], strides = [1, 1]} : vector<2x128xf32> to vector<2x32xf32>
    %83 = vector.extract_strided_slice %78 {offsets = [0, 96], sizes = [2, 32], strides = [1, 1]} : vector<2x128xf32> to vector<2x32xf32>
    %84 = arith.mulf %81, %64 : vector<2x32xf32>
    %85 = arith.mulf %80, %82 : vector<2x32xf32>
    %86 = arith.addf %84, %85 : vector<2x32xf32>
    %87 = math.tanh %86 : vector<2x32xf32>
    %88 = arith.mulf %83, %87 : vector<2x32xf32>
    %89 = arith.index_cast %69 : i32 to index
    %c0_21 = arith.constant 0 : index
    %90 = vector.load %arg9[%89, %c0_21] : memref<16x32xf32, #tpu.memory_space<vmem>>, vector<2x32xf32>
    tpu.vector_store %arg9[%89, %c0_21], %88 {strides = array<i32>} : memref<16x32xf32, #tpu.memory_space<vmem>>, vector<2x32xf32>,
    %c4_i32 = arith.constant 4 : i32
    %c2_i32_22 = arith.constant 2 : i32
    %91 = arith.muli %c4_i32, %c2_i32_22 : i32
    %92 = arith.index_cast %91 : i32 to index
    %c0_23 = arith.constant 0 : index
    %93 = vector.load %arg1[%92, %c0_23] : memref<16x128xf32, #tpu.memory_space<vmem>>, vector<2x128xf32>
    %cst_24 = arith.constant dense<0.000000e+00> : vector<2x128xf32>
    %94 = tpu.matmul %88, %0, %cst_24 {dimension_numbers = #tpu.dot_dimension_numbers<[1], [0], [0], [1], [0, 0, 1, 1], [], []>} : vector<2x32xf32>, vector<32x128xf32>, vector<2x128xf32> -> vector<2x128xf32>
    %95 = arith.addf %93, %94 : vector<2x128xf32>
    %96 = arith.negf %95 : vector<2x128xf32>
    %97 = math.exp %96 : vector<2x128xf32>
    %cst_25 = arith.constant 1.000000e+00 : f32
    %98 = vector.broadcast %cst_25 : f32 to vector<2x128xf32>
    %99 = arith.addf %98, %97 : vector<2x128xf32>
    %100 = arith.divf %98, %99 : vector<2x128xf32>
    %101 = math.tanh %95 : vector<2x128xf32>
    %102 = vector.extract_strided_slice %100 {offsets = [0, 0], sizes = [2, 32], strides = [1, 1]} : vector<2x128xf32> to vector<2x32xf32>
    %103 = vector.extract_strided_slice %100 {offsets = [0, 32], sizes = [2, 32], strides = [1, 1]} : vector<2x128xf32> to vector<2x32xf32>
    %104 = vector.extract_strided_slice %101 {offsets = [0, 64], sizes = [2, 32], strides = [1, 1]} : vector<2x128xf32> to vector<2x32xf32>
    %105 = vector.extract_strided_slice %100 {offsets = [0, 96], sizes = [2, 32], strides = [1, 1]} : vector<2x128xf32> to vector<2x32xf32>
    %106 = arith.mulf %103, %86 : vector<2x32xf32>
    %107 = arith.mulf %102, %104 : vector<2x32xf32>
    %108 = arith.addf %106, %107 : vector<2x32xf32>
    %109 = math.tanh %108 : vector<2x32xf32>
    %110 = arith.mulf %105, %109 : vector<2x32xf32>
    %111 = arith.index_cast %91 : i32 to index
    %c0_26 = arith.constant 0 : index
    %112 = vector.load %arg9[%111, %c0_26] : memref<16x32xf32, #tpu.memory_space<vmem>>, vector<2x32xf32>
    tpu.vector_store %arg9[%111, %c0_26], %110 {strides = array<i32>} : memref<16x32xf32, #tpu.memory_space<vmem>>, vector<2x32xf32>,
    %c5_i32 = arith.constant 5 : i32
    %c2_i32_27 = arith.constant 2 : i32
    %113 = arith.muli %c5_i32, %c2_i32_27 : i32
    %114 = arith.index_cast %113 : i32 to index
    %c0_28 = arith.constant 0 : index
    %115 = vector.load %arg1[%114, %c0_28] : memref<16x128xf32, #tpu.memory_space<vmem>>, vector<2x128xf32>
    %cst_29 = arith.constant dense<0.000000e+00> : vector<2x128xf32>
    %116 = tpu.matmul %110, %0, %cst_29 {dimension_numbers = #tpu.dot_dimension_numbers<[1], [0], [0], [1], [0, 0, 1, 1], [], []>} : vector<2x32xf32>, vector<32x128xf32>, vector<2x128xf32> -> vector<2x128xf32>
    %117 = arith.addf %115, %116 : vector<2x128xf32>
    %118 = arith.negf %117 : vector<2x128xf32>
    %119 = math.exp %118 : vector<2x128xf32>
    %cst_30 = arith.constant 1.000000e+00 : f32
    %120 = vector.broadcast %cst_30 : f32 to vector<2x128xf32>
    %121 = arith.addf %120, %119 : vector<2x128xf32>
    %122 = arith.divf %120, %121 : vector<2x128xf32>
    %123 = math.tanh %117 : vector<2x128xf32>
    %124 = vector.extract_strided_slice %122 {offsets = [0, 0], sizes = [2, 32], strides = [1, 1]} : vector<2x128xf32> to vector<2x32xf32>
    %125 = vector.extract_strided_slice %122 {offsets = [0, 32], sizes = [2, 32], strides = [1, 1]} : vector<2x128xf32> to vector<2x32xf32>
    %126 = vector.extract_strided_slice %123 {offsets = [0, 64], sizes = [2, 32], strides = [1, 1]} : vector<2x128xf32> to vector<2x32xf32>
    %127 = vector.extract_strided_slice %122 {offsets = [0, 96], sizes = [2, 32], strides = [1, 1]} : vector<2x128xf32> to vector<2x32xf32>
    %128 = arith.mulf %125, %108 : vector<2x32xf32>
    %129 = arith.mulf %124, %126 : vector<2x32xf32>
    %130 = arith.addf %128, %129 : vector<2x32xf32>
    %131 = math.tanh %130 : vector<2x32xf32>
    %132 = arith.mulf %127, %131 : vector<2x32xf32>
    %133 = arith.index_cast %113 : i32 to index
    %c0_31 = arith.constant 0 : index
    %134 = vector.load %arg9[%133, %c0_31] : memref<16x32xf32, #tpu.memory_space<vmem>>, vector<2x32xf32>
    tpu.vector_store %arg9[%133, %c0_31], %132 {strides = array<i32>} : memref<16x32xf32, #tpu.memory_space<vmem>>, vector<2x32xf32>,
    %c6_i32 = arith.constant 6 : i32
    %c2_i32_32 = arith.constant 2 : i32
    %135 = arith.muli %c6_i32, %c2_i32_32 : i32
    %136 = arith.index_cast %135 : i32 to index
    %c0_33 = arith.constant 0 : index
    %137 = vector.load %arg1[%136, %c0_33] : memref<16x128xf32, #tpu.memory_space<vmem>>, vector<2x128xf32>
    %cst_34 = arith.constant dense<0.000000e+00> : vector<2x128xf32>
    %138 = tpu.matmul %132, %0, %cst_34 {dimension_numbers = #tpu.dot_dimension_numbers<[1], [0], [0], [1], [0, 0, 1, 1], [], []>} : vector<2x32xf32>, vector<32x128xf32>, vector<2x128xf32> -> vector<2x128xf32>
    %139 = arith.addf %137, %138 : vector<2x128xf32>
    %140 = arith.negf %139 : vector<2x128xf32>
    %141 = math.exp %140 : vector<2x128xf32>
    %cst_35 = arith.constant 1.000000e+00 : f32
    %142 = vector.broadcast %cst_35 : f32 to vector<2x128xf32>
    %143 = arith.addf %142, %141 : vector<2x128xf32>
    %144 = arith.divf %142, %143 : vector<2x128xf32>
    %145 = math.tanh %139 : vector<2x128xf32>
    %146 = vector.extract_strided_slice %144 {offsets = [0, 0], sizes = [2, 32], strides = [1, 1]} : vector<2x128xf32> to vector<2x32xf32>
    %147 = vector.extract_strided_slice %144 {offsets = [0, 32], sizes = [2, 32], strides = [1, 1]} : vector<2x128xf32> to vector<2x32xf32>
    %148 = vector.extract_strided_slice %145 {offsets = [0, 64], sizes = [2, 32], strides = [1, 1]} : vector<2x128xf32> to vector<2x32xf32>
    %149 = vector.extract_strided_slice %144 {offsets = [0, 96], sizes = [2, 32], strides = [1, 1]} : vector<2x128xf32> to vector<2x32xf32>
    %150 = arith.mulf %147, %130 : vector<2x32xf32>
    %151 = arith.mulf %146, %148 : vector<2x32xf32>
    %152 = arith.addf %150, %151 : vector<2x32xf32>
    %153 = math.tanh %152 : vector<2x32xf32>
    %154 = arith.mulf %149, %153 : vector<2x32xf32>
    %155 = arith.index_cast %135 : i32 to index
    %c0_36 = arith.constant 0 : index
    %156 = vector.load %arg9[%155, %c0_36] : memref<16x32xf32, #tpu.memory_space<vmem>>, vector<2x32xf32>
    tpu.vector_store %arg9[%155, %c0_36], %154 {strides = array<i32>} : memref<16x32xf32, #tpu.memory_space<vmem>>, vector<2x32xf32>,
    %c7_i32 = arith.constant 7 : i32
    %c2_i32_37 = arith.constant 2 : i32
    %157 = arith.muli %c7_i32, %c2_i32_37 : i32
    %158 = arith.index_cast %157 : i32 to index
    %c0_38 = arith.constant 0 : index
    %159 = vector.load %arg1[%158, %c0_38] : memref<16x128xf32, #tpu.memory_space<vmem>>, vector<2x128xf32>
    %cst_39 = arith.constant dense<0.000000e+00> : vector<2x128xf32>
    %160 = tpu.matmul %154, %0, %cst_39 {dimension_numbers = #tpu.dot_dimension_numbers<[1], [0], [0], [1], [0, 0, 1, 1], [], []>} : vector<2x32xf32>, vector<32x128xf32>, vector<2x128xf32> -> vector<2x128xf32>
    %161 = arith.addf %159, %160 : vector<2x128xf32>
    %162 = arith.negf %161 : vector<2x128xf32>
    %163 = math.exp %162 : vector<2x128xf32>
    %cst_40 = arith.constant 1.000000e+00 : f32
    %164 = vector.broadcast %cst_40 : f32 to vector<2x128xf32>
    %165 = arith.addf %164, %163 : vector<2x128xf32>
    %166 = arith.divf %164, %165 : vector<2x128xf32>
    %167 = math.tanh %161 : vector<2x128xf32>
    %168 = vector.extract_strided_slice %166 {offsets = [0, 0], sizes = [2, 32], strides = [1, 1]} : vector<2x128xf32> to vector<2x32xf32>
    %169 = vector.extract_strided_slice %166 {offsets = [0, 32], sizes = [2, 32], strides = [1, 1]} : vector<2x128xf32> to vector<2x32xf32>
    %170 = vector.extract_strided_slice %167 {offsets = [0, 64], sizes = [2, 32], strides = [1, 1]} : vector<2x128xf32> to vector<2x32xf32>
    %171 = vector.extract_strided_slice %166 {offsets = [0, 96], sizes = [2, 32], strides = [1, 1]} : vector<2x128xf32> to vector<2x32xf32>
    %172 = arith.mulf %169, %152 : vector<2x32xf32>
    %173 = arith.mulf %168, %170 : vector<2x32xf32>
    %174 = arith.addf %172, %173 : vector<2x32xf32>
    %175 = math.tanh %174 : vector<2x32xf32>
    %176 = arith.mulf %171, %175 : vector<2x32xf32>
    %177 = arith.index_cast %157 : i32 to index
    %c0_41 = arith.constant 0 : index
    %178 = vector.load %arg9[%177, %c0_41] : memref<16x32xf32, #tpu.memory_space<vmem>>, vector<2x32xf32>
    tpu.vector_store %arg9[%177, %c0_41], %176 {strides = array<i32>} : memref<16x32xf32, #tpu.memory_space<vmem>>, vector<2x32xf32>,
    %c8_i32 = arith.constant 8 : i32
    %c0_42 = arith.constant 0 : index
    %c0_43 = arith.constant 0 : index
    %c0_44 = arith.constant 0 : index
    %179 = vector.load %arg7[%c0_42, %c0_43, %c0_44] : memref<2x2x32xf32, #tpu.memory_space<vmem>>, vector<1x2x32xf32>
    %180 = vector.shape_cast %179 : vector<1x2x32xf32> to vector<2x32xf32>
    %181 = vector.shape_cast %176 : vector<2x32xf32> to vector<1x2x32xf32>
    tpu.vector_store %arg7[%c0_42, %c0_43, %c0_44], %181 {strides = array<i32>} : memref<2x2x32xf32, #tpu.memory_space<vmem>>, vector<1x2x32xf32>,
    %c0_45 = arith.constant 0 : index
    %c0_46 = arith.constant 0 : index
    %c0_47 = arith.constant 0 : index
    %182 = vector.load %arg8[%c0_45, %c0_46, %c0_47] : memref<2x2x32xf32, #tpu.memory_space<vmem>>, vector<1x2x32xf32>
    %183 = vector.shape_cast %182 : vector<1x2x32xf32> to vector<2x32xf32>
    %184 = vector.shape_cast %174 : vector<2x32xf32> to vector<1x2x32xf32>
    tpu.vector_store %arg8[%c0_45, %c0_46, %c0_47], %184 {strides = array<i32>} : memref<2x2x32xf32, #tpu.memory_space<vmem>>, vector<1x2x32xf32>,
    %c0_48 = arith.constant 0 : index
    %c0_49 = arith.constant 0 : index
    %185 = vector.load %arg9[%c0_48, %c0_49] : memref<16x32xf32, #tpu.memory_space<vmem>>, vector<16x32xf32>
    %c0_50 = arith.constant 0 : index
    %c0_51 = arith.constant 0 : index
    %186 = vector.load %arg3[%c0_50, %c0_51] : memref<32x128xf32, #tpu.memory_space<vmem>>, vector<32x128xf32>
    %cst_52 = arith.constant dense<0.000000e+00> : vector<16x128xf32>
    %187 = tpu.matmul %185, %186, %cst_52 {dimension_numbers = #tpu.dot_dimension_numbers<[1], [0], [0], [1], [0, 0, 1, 1], [], []>} : vector<16x32xf32>, vector<32x128xf32>, vector<16x128xf32> -> vector<16x128xf32>
    %c0_53 = arith.constant 0 : index
    %c0_54 = arith.constant 0 : index
    %188 = vector.load %arg5[%c0_53, %c0_54] : memref<1x128xf32, #tpu.memory_space<vmem>>, vector<1x128xf32>
    %189 = vector.broadcast %188 : vector<1x128xf32> to vector<16x128xf32>
    %190 = arith.addf %187, %189 : vector<16x128xf32>
    %c0_55 = arith.constant 0 : index
    %c0_56 = arith.constant 0 : index
    %191 = vector.load %arg10[%c0_55, %c0_56] : memref<16x128xf32, #tpu.memory_space<vmem>>, vector<16x128xf32>
    tpu.vector_store %arg10[%c0_55, %c0_56], %190 {strides = array<i32>} : memref<16x128xf32, #tpu.memory_space<vmem>>, vector<16x128xf32>,
    %c0_57 = arith.constant 0 : index
    %c0_58 = arith.constant 0 : index
    %192 = vector.load %arg4[%c0_57, %c0_58] : memref<32x128xf32, #tpu.memory_space<vmem>>, vector<32x128xf32>
    %cst_59 = arith.constant 0.000000e+00 : f32
    %193 = vector.broadcast %cst_59 : f32 to vector<2x32xf32>
    %cst_60 = arith.constant 0.000000e+00 : f32
    %194 = vector.broadcast %cst_60 : f32 to vector<2x32xf32>
    %c0_i32_61 = arith.constant 0 : i32
    %c2_i32_62 = arith.constant 2 : i32
    %195 = arith.muli %c0_i32_61, %c2_i32_62 : i32
    %196 = arith.index_cast %195 : i32 to index
    %c0_63 = arith.constant 0 : index
    %197 = vector.load %arg10[%196, %c0_63] : memref<16x128xf32, #tpu.memory_space<vmem>>, vector<2x128xf32>
    %cst_64 = arith.constant dense<0.000000e+00> : vector<2x128xf32>
    %198 = tpu.matmul %193, %192, %cst_64 {dimension_numbers = #tpu.dot_dimension_numbers<[1], [0], [0], [1], [0, 0, 1, 1], [], []>} : vector<2x32xf32>, vector<32x128xf32>, vector<2x128xf32> -> vector<2x128xf32>
    %199 = arith.addf %197, %198 : vector<2x128xf32>
    %200 = arith.negf %199 : vector<2x128xf32>
    %201 = math.exp %200 : vector<2x128xf32>
    %cst_65 = arith.constant 1.000000e+00 : f32
    %202 = vector.broadcast %cst_65 : f32 to vector<2x128xf32>
    %203 = arith.addf %202, %201 : vector<2x128xf32>
    %204 = arith.divf %202, %203 : vector<2x128xf32>
    %205 = math.tanh %199 : vector<2x128xf32>
    %206 = vector.extract_strided_slice %204 {offsets = [0, 0], sizes = [2, 32], strides = [1, 1]} : vector<2x128xf32> to vector<2x32xf32>
    %207 = vector.extract_strided_slice %204 {offsets = [0, 32], sizes = [2, 32], strides = [1, 1]} : vector<2x128xf32> to vector<2x32xf32>
    %208 = vector.extract_strided_slice %205 {offsets = [0, 64], sizes = [2, 32], strides = [1, 1]} : vector<2x128xf32> to vector<2x32xf32>
    %209 = vector.extract_strided_slice %204 {offsets = [0, 96], sizes = [2, 32], strides = [1, 1]} : vector<2x128xf32> to vector<2x32xf32>
    %210 = arith.mulf %207, %194 : vector<2x32xf32>
    %211 = arith.mulf %206, %208 : vector<2x32xf32>
    %212 = arith.addf %210, %211 : vector<2x32xf32>
    %213 = math.tanh %212 : vector<2x32xf32>
    %214 = arith.mulf %209, %213 : vector<2x32xf32>
    %215 = arith.index_cast %195 : i32 to index
    %c0_66 = arith.constant 0 : index
    %216 = vector.load %arg6[%215, %c0_66] : memref<16x32xf32, #tpu.memory_space<vmem>>, vector<2x32xf32>
    tpu.vector_store %arg6[%215, %c0_66], %214 {strides = array<i32>} : memref<16x32xf32, #tpu.memory_space<vmem>>, vector<2x32xf32>,
    %c1_i32_67 = arith.constant 1 : i32
    %c2_i32_68 = arith.constant 2 : i32
    %217 = arith.muli %c1_i32_67, %c2_i32_68 : i32
    %218 = arith.index_cast %217 : i32 to index
    %c0_69 = arith.constant 0 : index
    %219 = vector.load %arg10[%218, %c0_69] : memref<16x128xf32, #tpu.memory_space<vmem>>, vector<2x128xf32>
    %cst_70 = arith.constant dense<0.000000e+00> : vector<2x128xf32>
    %220 = tpu.matmul %214, %192, %cst_70 {dimension_numbers = #tpu.dot_dimension_numbers<[1], [0], [0], [1], [0, 0, 1, 1], [], []>} : vector<2x32xf32>, vector<32x128xf32>, vector<2x128xf32> -> vector<2x128xf32>
    %221 = arith.addf %219, %220 : vector<2x128xf32>
    %222 = arith.negf %221 : vector<2x128xf32>
    %223 = math.exp %222 : vector<2x128xf32>
    %cst_71 = arith.constant 1.000000e+00 : f32
    %224 = vector.broadcast %cst_71 : f32 to vector<2x128xf32>
    %225 = arith.addf %224, %223 : vector<2x128xf32>
    %226 = arith.divf %224, %225 : vector<2x128xf32>
    %227 = math.tanh %221 : vector<2x128xf32>
    %228 = vector.extract_strided_slice %226 {offsets = [0, 0], sizes = [2, 32], strides = [1, 1]} : vector<2x128xf32> to vector<2x32xf32>
    %229 = vector.extract_strided_slice %226 {offsets = [0, 32], sizes = [2, 32], strides = [1, 1]} : vector<2x128xf32> to vector<2x32xf32>
    %230 = vector.extract_strided_slice %227 {offsets = [0, 64], sizes = [2, 32], strides = [1, 1]} : vector<2x128xf32> to vector<2x32xf32>
    %231 = vector.extract_strided_slice %226 {offsets = [0, 96], sizes = [2, 32], strides = [1, 1]} : vector<2x128xf32> to vector<2x32xf32>
    %232 = arith.mulf %229, %212 : vector<2x32xf32>
    %233 = arith.mulf %228, %230 : vector<2x32xf32>
    %234 = arith.addf %232, %233 : vector<2x32xf32>
    %235 = math.tanh %234 : vector<2x32xf32>
    %236 = arith.mulf %231, %235 : vector<2x32xf32>
    %237 = arith.index_cast %217 : i32 to index
    %c0_72 = arith.constant 0 : index
    %238 = vector.load %arg6[%237, %c0_72] : memref<16x32xf32, #tpu.memory_space<vmem>>, vector<2x32xf32>
    tpu.vector_store %arg6[%237, %c0_72], %236 {strides = array<i32>} : memref<16x32xf32, #tpu.memory_space<vmem>>, vector<2x32xf32>,
    %c2_i32_73 = arith.constant 2 : i32
    %c2_i32_74 = arith.constant 2 : i32
    %239 = arith.muli %c2_i32_73, %c2_i32_74 : i32
    %240 = arith.index_cast %239 : i32 to index
    %c0_75 = arith.constant 0 : index
    %241 = vector.load %arg10[%240, %c0_75] : memref<16x128xf32, #tpu.memory_space<vmem>>, vector<2x128xf32>
    %cst_76 = arith.constant dense<0.000000e+00> : vector<2x128xf32>
    %242 = tpu.matmul %236, %192, %cst_76 {dimension_numbers = #tpu.dot_dimension_numbers<[1], [0], [0], [1], [0, 0, 1, 1], [], []>} : vector<2x32xf32>, vector<32x128xf32>, vector<2x128xf32> -> vector<2x128xf32>
    %243 = arith.addf %241, %242 : vector<2x128xf32>
    %244 = arith.negf %243 : vector<2x128xf32>
    %245 = math.exp %244 : vector<2x128xf32>
    %cst_77 = arith.constant 1.000000e+00 : f32
    %246 = vector.broadcast %cst_77 : f32 to vector<2x128xf32>
    %247 = arith.addf %246, %245 : vector<2x128xf32>
    %248 = arith.divf %246, %247 : vector<2x128xf32>
    %249 = math.tanh %243 : vector<2x128xf32>
    %250 = vector.extract_strided_slice %248 {offsets = [0, 0], sizes = [2, 32], strides = [1, 1]} : vector<2x128xf32> to vector<2x32xf32>
    %251 = vector.extract_strided_slice %248 {offsets = [0, 32], sizes = [2, 32], strides = [1, 1]} : vector<2x128xf32> to vector<2x32xf32>
    %252 = vector.extract_strided_slice %249 {offsets = [0, 64], sizes = [2, 32], strides = [1, 1]} : vector<2x128xf32> to vector<2x32xf32>
    %253 = vector.extract_strided_slice %248 {offsets = [0, 96], sizes = [2, 32], strides = [1, 1]} : vector<2x128xf32> to vector<2x32xf32>
    %254 = arith.mulf %251, %234 : vector<2x32xf32>
    %255 = arith.mulf %250, %252 : vector<2x32xf32>
    %256 = arith.addf %254, %255 : vector<2x32xf32>
    %257 = math.tanh %256 : vector<2x32xf32>
    %258 = arith.mulf %253, %257 : vector<2x32xf32>
    %259 = arith.index_cast %239 : i32 to index
    %c0_78 = arith.constant 0 : index
    %260 = vector.load %arg6[%259, %c0_78] : memref<16x32xf32, #tpu.memory_space<vmem>>, vector<2x32xf32>
    tpu.vector_store %arg6[%259, %c0_78], %258 {strides = array<i32>} : memref<16x32xf32, #tpu.memory_space<vmem>>, vector<2x32xf32>,
    %c3_i32_79 = arith.constant 3 : i32
    %c2_i32_80 = arith.constant 2 : i32
    %261 = arith.muli %c3_i32_79, %c2_i32_80 : i32
    %262 = arith.index_cast %261 : i32 to index
    %c0_81 = arith.constant 0 : index
    %263 = vector.load %arg10[%262, %c0_81] : memref<16x128xf32, #tpu.memory_space<vmem>>, vector<2x128xf32>
    %cst_82 = arith.constant dense<0.000000e+00> : vector<2x128xf32>
    %264 = tpu.matmul %258, %192, %cst_82 {dimension_numbers = #tpu.dot_dimension_numbers<[1], [0], [0], [1], [0, 0, 1, 1], [], []>} : vector<2x32xf32>, vector<32x128xf32>, vector<2x128xf32> -> vector<2x128xf32>
    %265 = arith.addf %263, %264 : vector<2x128xf32>
    %266 = arith.negf %265 : vector<2x128xf32>
    %267 = math.exp %266 : vector<2x128xf32>
    %cst_83 = arith.constant 1.000000e+00 : f32
    %268 = vector.broadcast %cst_83 : f32 to vector<2x128xf32>
    %269 = arith.addf %268, %267 : vector<2x128xf32>
    %270 = arith.divf %268, %269 : vector<2x128xf32>
    %271 = math.tanh %265 : vector<2x128xf32>
    %272 = vector.extract_strided_slice %270 {offsets = [0, 0], sizes = [2, 32], strides = [1, 1]} : vector<2x128xf32> to vector<2x32xf32>
    %273 = vector.extract_strided_slice %270 {offsets = [0, 32], sizes = [2, 32], strides = [1, 1]} : vector<2x128xf32> to vector<2x32xf32>
    %274 = vector.extract_strided_slice %271 {offsets = [0, 64], sizes = [2, 32], strides = [1, 1]} : vector<2x128xf32> to vector<2x32xf32>
    %275 = vector.extract_strided_slice %270 {offsets = [0, 96], sizes = [2, 32], strides = [1, 1]} : vector<2x128xf32> to vector<2x32xf32>
    %276 = arith.mulf %273, %256 : vector<2x32xf32>
    %277 = arith.mulf %272, %274 : vector<2x32xf32>
    %278 = arith.addf %276, %277 : vector<2x32xf32>
    %279 = math.tanh %278 : vector<2x32xf32>
    %280 = arith.mulf %275, %279 : vector<2x32xf32>
    %281 = arith.index_cast %261 : i32 to index
    %c0_84 = arith.constant 0 : index
    %282 = vector.load %arg6[%281, %c0_84] : memref<16x32xf32, #tpu.memory_space<vmem>>, vector<2x32xf32>
    tpu.vector_store %arg6[%281, %c0_84], %280 {strides = array<i32>} : memref<16x32xf32, #tpu.memory_space<vmem>>, vector<2x32xf32>,
    %c4_i32_85 = arith.constant 4 : i32
    %c2_i32_86 = arith.constant 2 : i32
    %283 = arith.muli %c4_i32_85, %c2_i32_86 : i32
    %284 = arith.index_cast %283 : i32 to index
    %c0_87 = arith.constant 0 : index
    %285 = vector.load %arg10[%284, %c0_87] : memref<16x128xf32, #tpu.memory_space<vmem>>, vector<2x128xf32>
    %cst_88 = arith.constant dense<0.000000e+00> : vector<2x128xf32>
    %286 = tpu.matmul %280, %192, %cst_88 {dimension_numbers = #tpu.dot_dimension_numbers<[1], [0], [0], [1], [0, 0, 1, 1], [], []>} : vector<2x32xf32>, vector<32x128xf32>, vector<2x128xf32> -> vector<2x128xf32>
    %287 = arith.addf %285, %286 : vector<2x128xf32>
    %288 = arith.negf %287 : vector<2x128xf32>
    %289 = math.exp %288 : vector<2x128xf32>
    %cst_89 = arith.constant 1.000000e+00 : f32
    %290 = vector.broadcast %cst_89 : f32 to vector<2x128xf32>
    %291 = arith.addf %290, %289 : vector<2x128xf32>
    %292 = arith.divf %290, %291 : vector<2x128xf32>
    %293 = math.tanh %287 : vector<2x128xf32>
    %294 = vector.extract_strided_slice %292 {offsets = [0, 0], sizes = [2, 32], strides = [1, 1]} : vector<2x128xf32> to vector<2x32xf32>
    %295 = vector.extract_strided_slice %292 {offsets = [0, 32], sizes = [2, 32], strides = [1, 1]} : vector<2x128xf32> to vector<2x32xf32>
    %296 = vector.extract_strided_slice %293 {offsets = [0, 64], sizes = [2, 32], strides = [1, 1]} : vector<2x128xf32> to vector<2x32xf32>
    %297 = vector.extract_strided_slice %292 {offsets = [0, 96], sizes = [2, 32], strides = [1, 1]} : vector<2x128xf32> to vector<2x32xf32>
    %298 = arith.mulf %295, %278 : vector<2x32xf32>
    %299 = arith.mulf %294, %296 : vector<2x32xf32>
    %300 = arith.addf %298, %299 : vector<2x32xf32>
    %301 = math.tanh %300 : vector<2x32xf32>
    %302 = arith.mulf %297, %301 : vector<2x32xf32>
    %303 = arith.index_cast %283 : i32 to index
    %c0_90 = arith.constant 0 : index
    %304 = vector.load %arg6[%303, %c0_90] : memref<16x32xf32, #tpu.memory_space<vmem>>, vector<2x32xf32>
    tpu.vector_store %arg6[%303, %c0_90], %302 {strides = array<i32>} : memref<16x32xf32, #tpu.memory_space<vmem>>, vector<2x32xf32>,
    %c5_i32_91 = arith.constant 5 : i32
    %c2_i32_92 = arith.constant 2 : i32
    %305 = arith.muli %c5_i32_91, %c2_i32_92 : i32
    %306 = arith.index_cast %305 : i32 to index
    %c0_93 = arith.constant 0 : index
    %307 = vector.load %arg10[%306, %c0_93] : memref<16x128xf32, #tpu.memory_space<vmem>>, vector<2x128xf32>
    %cst_94 = arith.constant dense<0.000000e+00> : vector<2x128xf32>
    %308 = tpu.matmul %302, %192, %cst_94 {dimension_numbers = #tpu.dot_dimension_numbers<[1], [0], [0], [1], [0, 0, 1, 1], [], []>} : vector<2x32xf32>, vector<32x128xf32>, vector<2x128xf32> -> vector<2x128xf32>
    %309 = arith.addf %307, %308 : vector<2x128xf32>
    %310 = arith.negf %309 : vector<2x128xf32>
    %311 = math.exp %310 : vector<2x128xf32>
    %cst_95 = arith.constant 1.000000e+00 : f32
    %312 = vector.broadcast %cst_95 : f32 to vector<2x128xf32>
    %313 = arith.addf %312, %311 : vector<2x128xf32>
    %314 = arith.divf %312, %313 : vector<2x128xf32>
    %315 = math.tanh %309 : vector<2x128xf32>
    %316 = vector.extract_strided_slice %314 {offsets = [0, 0], sizes = [2, 32], strides = [1, 1]} : vector<2x128xf32> to vector<2x32xf32>
    %317 = vector.extract_strided_slice %314 {offsets = [0, 32], sizes = [2, 32], strides = [1, 1]} : vector<2x128xf32> to vector<2x32xf32>
    %318 = vector.extract_strided_slice %315 {offsets = [0, 64], sizes = [2, 32], strides = [1, 1]} : vector<2x128xf32> to vector<2x32xf32>
    %319 = vector.extract_strided_slice %314 {offsets = [0, 96], sizes = [2, 32], strides = [1, 1]} : vector<2x128xf32> to vector<2x32xf32>
    %320 = arith.mulf %317, %300 : vector<2x32xf32>
    %321 = arith.mulf %316, %318 : vector<2x32xf32>
    %322 = arith.addf %320, %321 : vector<2x32xf32>
    %323 = math.tanh %322 : vector<2x32xf32>
    %324 = arith.mulf %319, %323 : vector<2x32xf32>
    %325 = arith.index_cast %305 : i32 to index
    %c0_96 = arith.constant 0 : index
    %326 = vector.load %arg6[%325, %c0_96] : memref<16x32xf32, #tpu.memory_space<vmem>>, vector<2x32xf32>
    tpu.vector_store %arg6[%325, %c0_96], %324 {strides = array<i32>} : memref<16x32xf32, #tpu.memory_space<vmem>>, vector<2x32xf32>,
    %c6_i32_97 = arith.constant 6 : i32
    %c2_i32_98 = arith.constant 2 : i32
    %327 = arith.muli %c6_i32_97, %c2_i32_98 : i32
    %328 = arith.index_cast %327 : i32 to index
    %c0_99 = arith.constant 0 : index
    %329 = vector.load %arg10[%328, %c0_99] : memref<16x128xf32, #tpu.memory_space<vmem>>, vector<2x128xf32>
    %cst_100 = arith.constant dense<0.000000e+00> : vector<2x128xf32>
    %330 = tpu.matmul %324, %192, %cst_100 {dimension_numbers = #tpu.dot_dimension_numbers<[1], [0], [0], [1], [0, 0, 1, 1], [], []>} : vector<2x32xf32>, vector<32x128xf32>, vector<2x128xf32> -> vector<2x128xf32>
    %331 = arith.addf %329, %330 : vector<2x128xf32>
    %332 = arith.negf %331 : vector<2x128xf32>
    %333 = math.exp %332 : vector<2x128xf32>
    %cst_101 = arith.constant 1.000000e+00 : f32
    %334 = vector.broadcast %cst_101 : f32 to vector<2x128xf32>
    %335 = arith.addf %334, %333 : vector<2x128xf32>
    %336 = arith.divf %334, %335 : vector<2x128xf32>
    %337 = math.tanh %331 : vector<2x128xf32>
    %338 = vector.extract_strided_slice %336 {offsets = [0, 0], sizes = [2, 32], strides = [1, 1]} : vector<2x128xf32> to vector<2x32xf32>
    %339 = vector.extract_strided_slice %336 {offsets = [0, 32], sizes = [2, 32], strides = [1, 1]} : vector<2x128xf32> to vector<2x32xf32>
    %340 = vector.extract_strided_slice %337 {offsets = [0, 64], sizes = [2, 32], strides = [1, 1]} : vector<2x128xf32> to vector<2x32xf32>
    %341 = vector.extract_strided_slice %336 {offsets = [0, 96], sizes = [2, 32], strides = [1, 1]} : vector<2x128xf32> to vector<2x32xf32>
    %342 = arith.mulf %339, %322 : vector<2x32xf32>
    %343 = arith.mulf %338, %340 : vector<2x32xf32>
    %344 = arith.addf %342, %343 : vector<2x32xf32>
    %345 = math.tanh %344 : vector<2x32xf32>
    %346 = arith.mulf %341, %345 : vector<2x32xf32>
    %347 = arith.index_cast %327 : i32 to index
    %c0_102 = arith.constant 0 : index
    %348 = vector.load %arg6[%347, %c0_102] : memref<16x32xf32, #tpu.memory_space<vmem>>, vector<2x32xf32>
    tpu.vector_store %arg6[%347, %c0_102], %346 {strides = array<i32>} : memref<16x32xf32, #tpu.memory_space<vmem>>, vector<2x32xf32>,
    %c7_i32_103 = arith.constant 7 : i32
    %c2_i32_104 = arith.constant 2 : i32
    %349 = arith.muli %c7_i32_103, %c2_i32_104 : i32
    %350 = arith.index_cast %349 : i32 to index
    %c0_105 = arith.constant 0 : index
    %351 = vector.load %arg10[%350, %c0_105] : memref<16x128xf32, #tpu.memory_space<vmem>>, vector<2x128xf32>
    %cst_106 = arith.constant dense<0.000000e+00> : vector<2x128xf32>
    %352 = tpu.matmul %346, %192, %cst_106 {dimension_numbers = #tpu.dot_dimension_numbers<[1], [0], [0], [1], [0, 0, 1, 1], [], []>} : vector<2x32xf32>, vector<32x128xf32>, vector<2x128xf32> -> vector<2x128xf32>
    %353 = arith.addf %351, %352 : vector<2x128xf32>
    %354 = arith.negf %353 : vector<2x128xf32>
    %355 = math.exp %354 : vector<2x128xf32>
    %cst_107 = arith.constant 1.000000e+00 : f32
    %356 = vector.broadcast %cst_107 : f32 to vector<2x128xf32>
    %357 = arith.addf %356, %355 : vector<2x128xf32>
    %358 = arith.divf %356, %357 : vector<2x128xf32>
    %359 = math.tanh %353 : vector<2x128xf32>
    %360 = vector.extract_strided_slice %358 {offsets = [0, 0], sizes = [2, 32], strides = [1, 1]} : vector<2x128xf32> to vector<2x32xf32>
    %361 = vector.extract_strided_slice %358 {offsets = [0, 32], sizes = [2, 32], strides = [1, 1]} : vector<2x128xf32> to vector<2x32xf32>
    %362 = vector.extract_strided_slice %359 {offsets = [0, 64], sizes = [2, 32], strides = [1, 1]} : vector<2x128xf32> to vector<2x32xf32>
    %363 = vector.extract_strided_slice %358 {offsets = [0, 96], sizes = [2, 32], strides = [1, 1]} : vector<2x128xf32> to vector<2x32xf32>
    %364 = arith.mulf %361, %344 : vector<2x32xf32>
    %365 = arith.mulf %360, %362 : vector<2x32xf32>
    %366 = arith.addf %364, %365 : vector<2x32xf32>
    %367 = math.tanh %366 : vector<2x32xf32>
    %368 = arith.mulf %363, %367 : vector<2x32xf32>
    %369 = arith.index_cast %349 : i32 to index
    %c0_108 = arith.constant 0 : index
    %370 = vector.load %arg6[%369, %c0_108] : memref<16x32xf32, #tpu.memory_space<vmem>>, vector<2x32xf32>
    tpu.vector_store %arg6[%369, %c0_108], %368 {strides = array<i32>} : memref<16x32xf32, #tpu.memory_space<vmem>>, vector<2x32xf32>,
    %c8_i32_109 = arith.constant 8 : i32
    %c1 = arith.constant 1 : index
    %c0_110 = arith.constant 0 : index
    %c0_111 = arith.constant 0 : index
    %371 = vector.load %arg7[%c1, %c0_110, %c0_111] : memref<2x2x32xf32, #tpu.memory_space<vmem>>, vector<1x2x32xf32>
    %372 = vector.shape_cast %371 : vector<1x2x32xf32> to vector<2x32xf32>
    %373 = vector.shape_cast %368 : vector<2x32xf32> to vector<1x2x32xf32>
    tpu.vector_store %arg7[%c1, %c0_110, %c0_111], %373 {strides = array<i32>} : memref<2x2x32xf32, #tpu.memory_space<vmem>>, vector<1x2x32xf32>,
    %c1_112 = arith.constant 1 : index
    %c0_113 = arith.constant 0 : index
    %c0_114 = arith.constant 0 : index
    %374 = vector.load %arg8[%c1_112, %c0_113, %c0_114] : memref<2x2x32xf32, #tpu.memory_space<vmem>>, vector<1x2x32xf32>
    %375 = vector.shape_cast %374 : vector<1x2x32xf32> to vector<2x32xf32>
    %376 = vector.shape_cast %366 : vector<2x32xf32> to vector<1x2x32xf32>
    tpu.vector_store %arg8[%c1_112, %c0_113, %c0_114], %376 {strides = array<i32>} : memref<2x2x32xf32, #tpu.memory_space<vmem>>, vector<1x2x32xf32>,
    return
  }
  func.func @transform_0(%arg0: i32) -> (i32, i32) {
    %c0_i32 = arith.constant 0 : i32
    %c0_i32_0 = arith.constant 0 : i32
    %c0_i32_1 = arith.constant 0 : i32
    return %c0_i32, %c0_i32_0 : i32, i32
  }
  func.func @transform_1(%arg0: i32) -> (i32, i32) {
    %c0_i32 = arith.constant 0 : i32
    %c0_i32_0 = arith.constant 0 : i32
    %c0_i32_1 = arith.constant 0 : i32
    return %c0_i32, %c0_i32_0 : i32, i32
  }
  func.func @transform_2(%arg0: i32) -> (i32, i32) {
    %c0_i32 = arith.constant 0 : i32
    %c0_i32_0 = arith.constant 0 : i32
    %c0_i32_1 = arith.constant 0 : i32
    return %c0_i32, %c0_i32_0 : i32, i32
  }
  func.func @transform_3(%arg0: i32) -> (i32, i32) {
    %c0_i32 = arith.constant 0 : i32
    %c0_i32_0 = arith.constant 0 : i32
    %c0_i32_1 = arith.constant 0 : i32
    return %c0_i32, %c0_i32_0 : i32, i32
  }
  func.func @transform_4(%arg0: i32) -> (i32, i32) {
    %c0_i32 = arith.constant 0 : i32
    %c0_i32_0 = arith.constant 0 : i32
    %c0_i32_1 = arith.constant 0 : i32
    return %c0_i32, %c0_i32_0 : i32, i32
  }
  func.func @transform_5(%arg0: i32) -> (i32, i32) {
    %c0_i32 = arith.constant 0 : i32
    %c0_i32_0 = arith.constant 0 : i32
    %c0_i32_1 = arith.constant 0 : i32
    return %c0_i32, %c0_i32_0 : i32, i32
  }
  func.func @transform_6(%arg0: i32) -> (i32, i32, i32) {
    %c0_i32 = arith.constant 0 : i32
    %c0_i32_0 = arith.constant 0 : i32
    %c0_i32_1 = arith.constant 0 : i32
    %c0_i32_2 = arith.constant 0 : i32
    return %c0_i32, %c0_i32_0, %c0_i32_1 : i32, i32, i32
  }
  func.func @transform_7(%arg0: i32) -> (i32, i32, i32) {
    %c0_i32 = arith.constant 0 : i32
    %c0_i32_0 = arith.constant 0 : i32
    %c0_i32_1 = arith.constant 0 : i32
    %c0_i32_2 = arith.constant 0 : i32
    return %c0_i32, %c0_i32_0, %c0_i32_1 : i32, i32, i32
  }
}

</mosaic_0001>

<bundles_post_ra>
// kernel: tpu_custom_call.1
= control target key start
LH: loop header
LB: loop body
LE: loop exit
PB: predicated region body
PF: predicated region fallthrough
CT: control target
= control target key end

     0   :  { %13 = vsyncpa [#allocation5], 0  ;;  %s3017_s0 = inlined_call_operand.hbm [shape: f32[16,128], index: 0, kind: input, shape index: {}]   ;;  %s3018_s1 = inlined_call_operand.hbm [shape: f32[32,128], index: 1, kind: input, shape index: {}]   ;;  %s3019_s2 = inlined_call_operand.hbm [shape: f32[32,128], index: 2, kind: input, shape index: {}]   ;;  %s3020_s3 = inlined_call_operand.hbm [shape: f32[32,128], index: 3, kind: input, shape index: {}]   ;;  %s3021_s4 = inlined_call_operand.vmem [shape: f32[1,128], index: 4, kind: input, shape index: {}]   ;;  %s3022_s5 = inlined_call_operand.hbm [shape: f32[16,32], index: 5, kind: output, shape index: {0}]   ;;  %s3023_s6 = inlined_call_operand.hbm [shape: f32[2,2,32], index: 6, kind: output, shape index: {1}]   ;;  %s3024_s7 = inlined_call_operand.hbm [shape: f32[2,2,32], index: 7, kind: output, shape index: {2}]  }
   0x1   :  { %14 = vsyncpa [#allocation8], 0 }
   0x2   :  { %15 = vsyncpa [#allocation11], 0 }
   0x3   :  { %16 = vsyncpa [#allocation6], 0 }
   0x4   :  { %17 = vsyncpa [#allocation14], 0  ;;  %s2615_s24 = smov [#allocation7]   ;;  %s2616_s26 = smov [#allocation4]  }
   0x5   :  { %s35_s25 = sshll.u32 %s2615_s24, 4  ;;  %s23_s27 = sshll.u32 %s2616_s26, 4  ;;  %s36_s25 = int_to_ptr.vmem [resolvable:$true] %s35_s25  ;;  %s2671_s27 = int_to_ptr.vmem [resolvable:$true] %s23_s27 }
   0x6   :  { %s2451_s30 = scalar_lea.hbm %s3018_s1, 512 }
   0x7   :  { %p2452_p0 = scmp.ne.s32.totalorder %s3018_s1, %s2451_s30  ;;  %p2455_p1 = scmp.lt.u32.totalorder %s2451_s30, %s3018_s1 }
   0x9   :  { %p2457_p2 = pnand %p2455_p1, %p2452_p0 }
   0xb   :  { %2460 = shalt.err (!%p2457_p2)
}
   0xc   :  { %s2461_s12 = scalar_lea.vmem %s36_s25, 512  ;;  %p2466_p4 = scmp.lt.s32.totalorder %s36_s25, %s36_s25 }
   0xd   :  { %p2462_p3 = scmp.ne.s32.totalorder %s36_s25, %s2461_s12  ;;  %p2467_p5 = scmp.lt.s32.totalorder %s2461_s12, %s2461_s12 }
   0xf   :  { %p2468_p6 = por %p2467_p5, %p2466_p4 }
  0x11   :  { %p2469_p7 = pnand %p2468_p6, %p2462_p3 }
  0x13   :  { %2472 = shalt.err (!%p2469_p7)
}
  0x14   :  { %s2617_s13 = smov 128   ;;  %s2618_s14 = smov 8  }
  0x15   :  { %41 = dma.hbm_to_vmem [thread:$0]  %s3018_s1, 512, %s36_s25, [#allocation8], %s2617_s13, %s2617_s13, %s2618_s14  }
  0x16   :  { %s2473_s19 = scalar_lea.hbm %s3017_s0, 256 }
  0x17   :  { %p2474_p8 = scmp.ne.s32.totalorder %s3017_s0, %s2473_s19  ;;  %p2477_p9 = scmp.lt.u32.totalorder %s2473_s19, %s3017_s0 }
  0x19   :  { %p2479_p10 = pnand %p2477_p9, %p2474_p8 }
  0x1b   :  { %2482 = shalt.err (!%p2479_p10)
}
  0x1c   :  { %s2483_s24 = scalar_lea.vmem %s2671_s27, 256  ;;  %p2488_p12 = scmp.lt.s32.totalorder %s2671_s27, %s2671_s27 }
  0x1d   :  { %p2484_p11 = scmp.ne.s32.totalorder %s2671_s27, %s2483_s24  ;;  %p2489_p13 = scmp.lt.s32.totalorder %s2483_s24, %s2483_s24 }
  0x1f   :  { %p2490_p0 = por %p2489_p13, %p2488_p12 }
  0x21   :  { %p2491_p1 = pnand %p2490_p0, %p2484_p11 }
  0x23   :  { %2494 = shalt.err (!%p2491_p1)
}
  0x24   :  { %29 = dma.hbm_to_vmem [thread:$0]  %s3017_s0, 256, %s2671_s27, [#allocation5], %s2617_s13, %s2617_s13, %s2618_s14  }
  0x25   :  { %s2619_s26 = smov [#allocation9]   ;;  %s2620_s29 = smov [#allocation10]  }
  0x26   :  { %s47_s28 = sshll.u32 %s2619_s26, 4  ;;  %s59_s30 = sshll.u32 %s2620_s29, 4  ;;  %s48_s28 = int_to_ptr.vmem [resolvable:$true] %s47_s28  ;;  %s2708_s30 = int_to_ptr.vmem [resolvable:$true] %s59_s30 }
  0x27   :  { %s2495_s10 = scalar_lea.hbm %s3019_s2, 512 }
  0x28   :  { %p2496_p2 = scmp.ne.s32.totalorder %s3019_s2, %s2495_s10  ;;  %p2499_p3 = scmp.lt.u32.totalorder %s2495_s10, %s3019_s2 }
  0x2a   :  { %p2501_p4 = pnand %p2499_p3, %p2496_p2 }
  0x2c   :  { %2504 = shalt.err (!%p2501_p4)
}
  0x2d   :  { %s2505_s0 = scalar_lea.vmem %s48_s28, 512  ;;  %p2510_p6 = scmp.lt.s32.totalorder %s48_s28, %s48_s28 }
  0x2e   :  { %p2506_p5 = scmp.ne.s32.totalorder %s48_s28, %s2505_s0  ;;  %p2511_p7 = scmp.lt.s32.totalorder %s2505_s0, %s2505_s0 }
  0x30   :  { %p2512_p8 = por %p2511_p7, %p2510_p6 }
  0x32   :  { %p2513_p9 = pnand %p2512_p8, %p2506_p5 }
  0x34   :  { %2516 = shalt.err (!%p2513_p9)
}
  0x35   :  { %53 = dma.hbm_to_vmem [thread:$0]  %s3019_s2, 512, %s48_s28, [#allocation8], %s2617_s13, %s2617_s13, %s2618_s14  }
  0x36   :  { %s2517_s20 = scalar_lea.hbm %s3020_s3, 512 }
  0x37   :  { %p2518_p10 = scmp.ne.s32.totalorder %s3020_s3, %s2517_s20  ;;  %p2521_p11 = scmp.lt.u32.totalorder %s2517_s20, %s3020_s3 }
  0x39   :  { %p2523_p12 = pnand %p2521_p11, %p2518_p10 }
  0x3b   :  { %2526 = shalt.err (!%p2523_p12)
}
  0x3c   :  { %s2527_s1 = scalar_lea.vmem %s2708_s30, 512  ;;  %p2532_p0 = scmp.lt.s32.totalorder %s2708_s30, %s2708_s30 }
  0x3d   :  { %p2528_p13 = scmp.ne.s32.totalorder %s2708_s30, %s2527_s1  ;;  %p2533_p1 = scmp.lt.s32.totalorder %s2527_s1, %s2527_s1 }
  0x3f   :  { %p2534_p2 = por %p2533_p1, %p2532_p0 }
  0x41   :  { %p2535_p3 = pnand %p2534_p2, %p2528_p13 }
  0x43   :  { %2538 = shalt.err (!%p2535_p3)
}
  0x44   :  { %65 = dma.hbm_to_vmem [thread:$0]  %s3020_s3, 512, %s2708_s30, [#allocation11], %s2617_s13, %s2617_s13, %s2618_s14  }
  0x45   :  { %2605 = dma.done.wait [#allocation5], 256  }
  0x46   :  { %2606 = vsyncadd [#allocation5], 4294967040 }
  0x47   :  { %2607 = dma.done.wait [#allocation8], 1024  }
  0x48   :  { %2608 = vsyncadd [#allocation8], 4294966272 }
  0x49   :  { %2609 = dma.done.wait [#allocation11], 512  }
  0x4a   :  { %2610 = vsyncadd [#allocation11], 4294966784  ;;  %v2621_v0 = vmov 0.0|0.0   ;;  %vm2622_vm0 = vmmov 0   ;;  %v2623_v1 = vmov 0.0   ;;  %v80_v2 = vld [vmem:[#allocation7] sm:$0xff] }
  0x4b   :  { %2203 = vmatprep.subr.bf16.mxu0 %v2621_v0  ;;  %2024 = vmatprep.mubr.msk.f32.mxu0 %vm2622_vm0, %v2623_v1  ;;  %v81_v3 = vld [vmem:[#allocation7 + $0x8] sm:$0xff]  ;;  %v82_v4 = vld [vmem:[#allocation7 + $0x10] sm:$0xff]  ;;  %v83_v6 = vld [vmem:[#allocation7 + $0x18] sm:$0xff]  ;;  %s2624_s3 = smov 64   ;;  %s2625_s26 = smov 32   ;;  %vm188_vm1 = vcmask 254976  }
  0x4c   :  { %2209 = vmatprep.subr.bf16.mxu1 %v2621_v0  ;;  %2035 = vmatprep.mubr.msk.f32.mxu1 %vm2622_vm0, %v2623_v1  ;;  %v2751_v5 = vpack.c.bf16 %v81_v3, %v80_v2  ;;  %v2754_v7 = vpack.c.bf16 %v83_v6, %v82_v4  ;;  %v84_v8 = vld [vmem:[#allocation4] sm:$0x3]  ;;  %vm85_vm2 = vcmask 261120   ;;  %v190_v26 = vld [vmem:[#allocation4 + $0x2] sm:$0x3]  ;;  %s2627_s30 = smov [#allocation13]  }
  0x4d   :  { %v293_v44 = vld [vmem:[#allocation4 + $0x4] sm:$0x3]  ;;  %v396_v62 = vld [vmem:[#allocation4 + $0x6] sm:$0x3]  ;;  %s1864_s8 = sshll.u32 %s2627_s30, 4  ;;  %s2628_s9 = smov [#allocation12]   ;;  %s1865_s8 = int_to_ptr.vmem [resolvable:$true] %s1864_s8 }
  0x4e   :  { %2205 = vmatpush3.bf16.msra.mxu0 %v2751_v5  ;;  %2211 = vmatpush3.bf16.msra.mxu1 %v2751_v5  ;;  %s1852_s10 = sshll.u32 %s2628_s9, 4  ;;  %s2629_s11 = smov [#allocation15]   ;;  %s2955_s10 = int_to_ptr.vmem [resolvable:$true] %s1852_s10 }
  0x4f   :  { %2206 = vmatprep.subr.bf16.mxu0 %v2621_v0  ;;  %2212 = vmatprep.subr.bf16.mxu1 %v2621_v0  ;;  %s1876_s12 = sshll.u32 %s2629_s11, 4  ;;  %s2539_s15 = scalar_lea.vmem %s1865_s8, 64  ;;  %s2959_s12 = int_to_ptr.vmem [resolvable:$true] %s1876_s12 }
  0x50   :  { %p2540_p4 = scmp.ne.s32.totalorder %s1865_s8, %s2539_s15  ;;  %p2544_p5 = scmp.lt.s32.totalorder %s1865_s8, %s1865_s8 }
  0x51   :  { %p2545_p6 = scmp.lt.s32.totalorder %s2539_s15, %s2539_s15 }
  0x52   :  { %2208 = vmatpush3.bf16.msra.mxu0 %v2754_v7  ;;  %2214 = vmatpush3.bf16.msra.mxu1 %v2754_v7 }
  0x53   :  { %2215 = vmatprep.subr.bf16.mxu0 %v2621_v0  ;;  %2221 = vmatprep.subr.bf16.mxu1 %v2621_v0  ;;  %p2546_p7 = por %p2545_p6, %p2544_p5 }
  0x55   :  { %2025 = vmatmul.mubr.f32.vlgmr.msra.gmra.mrb[0].mxu0 %v2623_v1  ;;  %p2547_p8 = pnand %p2546_p7, %p2540_p4 }
  0x56   :  { %2217 = vmatpush3.bf16.msra.mxu0 %v2751_v5  ;;  %2046 = vmatprep.mubr.msk.f32.mxu0 %vm2622_vm0, %v2623_v1 }
  0x57   :  { %2218 = vmatprep.subr.bf16.mxu0 %v2621_v0 }
  0x5a   :  { %2220 = vmatpush3.bf16.msra.mxu0 %v2754_v7 }
  0x5b   :  { %2227 = vmatprep.subr.bf16.mxu0 %v2621_v0 }
 0x128   :  { %v155_v9 = vpop.f32.mrb[0].mxu0 }
 0x129   :  { %v159_v10 = vadd.f32 %v155_v9, %v84_v8  ;;  %v2026_v11 = vpop.f32.mrb[1].mxu0 }
 0x12b   :  { %2323 = vtanh.f32 %v159_v10  ;;  %v1897_v13 = vmul.f32 -1.442695, %v159_v10 }
 0x12d   :  { %2325 = vpow2.f32 %v1897_v13 }
 0x135   :  { %v2324_v12 = vpop.eup %2323 }
 0x136   :  { %169 = vrot.lane.b32.xlu0 %v2324_v12, %s2624_s3 }
 0x137   :  { %v2326_v14 = vpop.eup %2325 }
 0x138   :  { %v163_v15 = vadd.f32 1.0, %v2326_v14 }
 0x13a   :  { %2327 = vrcp.f32 %v163_v15 }
 0x144   :  { %v2328_v16 = vpop.eup %2327 }
 0x145   :  { %v167_v19 = vmul.f32 0.0, %v2328_v16 }
 0x1a8   :  { %v170_v17 = vpop.permute.xlu0 %169 }
 0x1a9   :  { %v172_v18 = vmul.f32 %v2328_v16, %v170_v17 }
 0x1ab   :  { %174 = vrot.lane.b32.xlu0 %v172_v18, %s2625_s26 }
 0x21d   :  { %v175_v20 = vpop.permute.xlu0 %174 }
 0x21e   :  { %v177_v21 = vadd.f32 %v175_v20, %v167_v19  ;;  %v499_v20 = vld [vmem:[#allocation4 + $0x8] sm:$0x3] }
 0x220   :  { %2329 = vtanh.f32 %v177_v21 }
 0x22a   :  { %v2330_v22 = vpop.eup %2329 }
 0x22b   :  { %180 = vrot.lane.b32.xlu1 %v2330_v22, %s2624_s3 }
 0x29d   :  { %v181_v23 = vpop.permute.xlu1 %180 }
 0x29e   :  { %v183_v24 = vmul.f32 %v2328_v16, %v181_v23 }
 0x2a0   :  { %185 = vrot.lane.b32.xlu1 %v183_v24, %s2625_s26 }
 0x312   :  { %v186_v25 = vpop.permute.xlu1 %185 }
 0x313   :  { %189 = vst.msk [vmem:[#allocation2] sm:$0x3] %vm188_vm1, %v186_v25  ;;  %2036 = vmatmul.mubr.msk.f32.vlgmr.msra.gmra.mrb[0].mxu1 %vm85_vm2, %v186_v25 }
 0x314   :  { %2223 = vmatpush3.bf16.msra.mxu1 %v2751_v5  ;;  %2057 = vmatprep.mubr.msk.f32.mxu1 %vm2622_vm0, %v2623_v1 }
 0x315   :  { %2224 = vmatprep.subr.bf16.mxu1 %v2621_v0 }
 0x318   :  { %2226 = vmatpush3.bf16.msra.mxu1 %v2754_v7 }
 0x319   :  { %2233 = vmatprep.subr.bf16.mxu1 %v2621_v0 }
 0x3e6   :  { %v259_v27 = vpop.f32.mrb[0].mxu1 }
 0x3e7   :  { %v263_v28 = vadd.f32 %v259_v27, %v190_v26  ;;  %v2037_v29 = vpop.f32.mrb[1].mxu1 }
 0x3e9   :  { %2331 = vtanh.f32 %v263_v28  ;;  %v1899_v31 = vmul.f32 -1.442695, %v263_v28 }
 0x3eb   :  { %2333 = vpow2.f32 %v1899_v31 }
 0x3f3   :  { %v2332_v30 = vpop.eup %2331 }
 0x3f4   :  { %273 = vrot.lane.b32.xlu0 %v2332_v30, %s2624_s3 }
 0x3f5   :  { %v2334_v32 = vpop.eup %2333 }
 0x3f6   :  { %v267_v33 = vadd.f32 1.0, %v2334_v32 }
 0x3f8   :  { %2335 = vrcp.f32 %v267_v33 }
 0x402   :  { %v2336_v34 = vpop.eup %2335 }
 0x403   :  { %v271_v37 = vmul.f32 %v2336_v34, %v177_v21 }
 0x466   :  { %v274_v35 = vpop.permute.xlu0 %273 }
 0x467   :  { %v276_v36 = vmul.f32 %v2336_v34, %v274_v35 }
 0x469   :  { %278 = vrot.lane.b32.xlu1 %v276_v36, %s2625_s26 }
 0x4db   :  { %v279_v38 = vpop.permute.xlu1 %278 }
 0x4dc   :  { %v281_v39 = vadd.f32 %v279_v38, %v271_v37  ;;  %v602_v38 = vld [vmem:[#allocation4 + $0xa] sm:$0x3] }
 0x4de   :  { %2337 = vtanh.f32 %v281_v39 }
 0x4e8   :  { %v2338_v40 = vpop.eup %2337 }
 0x4e9   :  { %284 = vrot.lane.b32.xlu0 %v2338_v40, %s2624_s3 }
 0x55b   :  { %v285_v41 = vpop.permute.xlu0 %284 }
 0x55c   :  { %v287_v42 = vmul.f32 %v2336_v34, %v285_v41 }
 0x55e   :  { %289 = vrot.lane.b32.xlu1 %v287_v42, %s2625_s26 }
 0x5d0   :  { %v290_v43 = vpop.permute.xlu1 %289 }
 0x5d1   :  { %292 = vst.msk [vmem:[#allocation2 + $0x2] sm:$0x3] %vm188_vm1, %v290_v43  ;;  %2047 = vmatmul.mubr.msk.f32.vlgmr.msra.gmra.mrb[2].mxu0 %vm85_vm2, %v290_v43 }
 0x5d2   :  { %2229 = vmatpush3.bf16.msra.mxu0 %v2751_v5  ;;  %2068 = vmatprep.mubr.msk.f32.mxu0 %vm2622_vm0, %v2623_v1 }
 0x5d3   :  { %2230 = vmatprep.subr.bf16.mxu0 %v2621_v0 }
 0x5d6   :  { %2232 = vmatpush3.bf16.msra.mxu0 %v2754_v7 }
 0x5d7   :  { %2239 = vmatprep.subr.bf16.mxu0 %v2621_v0 }
 0x6a4   :  { %v362_v45 = vpop.f32.mrb[2].mxu0 }
 0x6a5   :  { %v366_v46 = vadd.f32 %v362_v45, %v293_v44  ;;  %v2048_v47 = vpop.f32.mrb[3].mxu0 }
 0x6a7   :  { %2339 = vtanh.f32 %v366_v46  ;;  %v1901_v49 = vmul.f32 -1.442695, %v366_v46 }
 0x6a9   :  { %2341 = vpow2.f32 %v1901_v49 }
 0x6b1   :  { %v2340_v48 = vpop.eup %2339 }
 0x6b2   :  { %376 = vrot.lane.b32.xlu0 %v2340_v48, %s2624_s3 }
 0x6b3   :  { %v2342_v50 = vpop.eup %2341 }
 0x6b4   :  { %v370_v51 = vadd.f32 1.0, %v2342_v50 }
 0x6b6   :  { %2343 = vrcp.f32 %v370_v51 }
 0x6c0   :  { %v2344_v52 = vpop.eup %2343 }
 0x6c1   :  { %v374_v55 = vmul.f32 %v2344_v52, %v281_v39 }
 0x724   :  { %v377_v53 = vpop.permute.xlu0 %376 }
 0x725   :  { %v379_v54 = vmul.f32 %v2344_v52, %v377_v53 }
 0x727   :  { %381 = vrot.lane.b32.xlu1 %v379_v54, %s2625_s26 }
 0x799   :  { %v382_v56 = vpop.permute.xlu1 %381 }
 0x79a   :  { %v384_v57 = vadd.f32 %v382_v56, %v374_v55  ;;  %v705_v55 = vld [vmem:[#allocation4 + $0xc] sm:$0x3] }
 0x79c   :  { %2345 = vtanh.f32 %v384_v57 }
 0x7a6   :  { %v2346_v58 = vpop.eup %2345 }
 0x7a7   :  { %387 = vrot.lane.b32.xlu0 %v2346_v58, %s2624_s3 }
 0x819   :  { %v388_v59 = vpop.permute.xlu0 %387 }
 0x81a   :  { %v390_v60 = vmul.f32 %v2344_v52, %v388_v59 }
 0x81c   :  { %392 = vrot.lane.b32.xlu1 %v390_v60, %s2625_s26 }
 0x88e   :  { %v393_v61 = vpop.permute.xlu1 %392 }
 0x88f   :  { %395 = vst.msk [vmem:[#allocation2 + $0x4] sm:$0x3] %vm188_vm1, %v393_v61  ;;  %2058 = vmatmul.mubr.msk.f32.vlgmr.msra.gmra.mrb[2].mxu1 %vm85_vm2, %v393_v61 }
 0x890   :  { %2235 = vmatpush3.bf16.msra.mxu1 %v2751_v5  ;;  %2079 = vmatprep.mubr.msk.f32.mxu1 %vm2622_vm0, %v2623_v1 }
 0x891   :  { %2236 = vmatprep.subr.bf16.mxu1 %v2621_v0 }
 0x894   :  { %2238 = vmatpush3.bf16.msra.mxu1 %v2754_v7 }
 0x895   :  { %2245 = vmatprep.subr.bf16.mxu1 %v2621_v0 }
 0x962   :  { %v465_v63 = vpop.f32.mrb[2].mxu1 }
 0x963   :  { %v469_v2 = vadd.f32 %v465_v63, %v396_v62  ;;  %v2059_v3 = vpop.f32.mrb[3].mxu1 }
 0x965   :  { %2347 = vtanh.f32 %v469_v2  ;;  %v1903_v6 = vmul.f32 -1.442695, %v469_v2 }
 0x967   :  { %2349 = vpow2.f32 %v1903_v6 }
 0x96f   :  { %v2348_v4 = vpop.eup %2347 }
 0x970   :  { %479 = vrot.lane.b32.xlu0 %v2348_v4, %s2624_s3 }
 0x971   :  { %v2350_v8 = vpop.eup %2349 }
 0x972   :  { %v473_v9 = vadd.f32 1.0, %v2350_v8 }
 0x974   :  { %2351 = vrcp.f32 %v473_v9 }
 0x97e   :  { %v2352_v10 = vpop.eup %2351 }
 0x97f   :  { %v477_v13 = vmul.f32 %v2352_v10, %v384_v57 }
 0x9e2   :  { %v480_v11 = vpop.permute.xlu0 %479 }
 0x9e3   :  { %v482_v12 = vmul.f32 %v2352_v10, %v480_v11 }
 0x9e5   :  { %484 = vrot.lane.b32.xlu1 %v482_v12, %s2625_s26 }
 0xa57   :  { %v485_v14 = vpop.permute.xlu1 %484 }
 0xa58   :  { %v487_v15 = vadd.f32 %v485_v14, %v477_v13  ;;  %v808_v13 = vld [vmem:[#allocation4 + $0xe] sm:$0x3] }
 0xa5a   :  { %2353 = vtanh.f32 %v487_v15 }
 0xa64   :  { %v2354_v16 = vpop.eup %2353 }
 0xa65   :  { %490 = vrot.lane.b32.xlu0 %v2354_v16, %s2624_s3 }
 0xad7   :  { %v491_v17 = vpop.permute.xlu0 %490 }
 0xad8   :  { %v493_v18 = vmul.f32 %v2352_v10, %v491_v17 }
 0xada   :  { %495 = vrot.lane.b32.xlu1 %v493_v18, %s2625_s26 }
 0xb4c   :  { %v496_v19 = vpop.permute.xlu1 %495 }
 0xb4d   :  { %498 = vst.msk [vmem:[#allocation2 + $0x6] sm:$0x3] %vm188_vm1, %v496_v19  ;;  %2069 = vmatmul.mubr.msk.f32.vlgmr.msra.gmra.mrb[4].mxu0 %vm85_vm2, %v496_v19 }
 0xb4e   :  { %2241 = vmatpush3.bf16.msra.mxu0 %v2751_v5  ;;  %2090 = vmatprep.mubr.msk.f32.mxu0 %vm2622_vm0, %v2623_v1 }
 0xb4f   :  { %2242 = vmatprep.subr.bf16.mxu0 %v2621_v0 }
 0xb52   :  { %2244 = vmatpush3.bf16.msra.mxu0 %v2754_v7 }
 0xb54   :  { %v917_v54 = vld [vmem:[#allocation2] sm:$0xff] }
 0xc20   :  { %v568_v21 = vpop.f32.mrb[4].mxu0 }
 0xc21   :  { %v572_v22 = vadd.f32 %v568_v21, %v499_v20  ;;  %v2070_v23 = vpop.f32.mrb[5].mxu0 }
 0xc23   :  { %2355 = vtanh.f32 %v572_v22  ;;  %v1905_v25 = vmul.f32 -1.442695, %v572_v22 }
 0xc25   :  { %2357 = vpow2.f32 %v1905_v25 }
 0xc2d   :  { %v2356_v24 = vpop.eup %2355 }
 0xc2e   :  { %582 = vrot.lane.b32.xlu0 %v2356_v24, %s2624_s3 }
 0xc2f   :  { %v2358_v26 = vpop.eup %2357 }
 0xc30   :  { %v576_v27 = vadd.f32 1.0, %v2358_v26 }
 0xc32   :  { %2359 = vrcp.f32 %v576_v27 }
 0xc3c   :  { %v2360_v28 = vpop.eup %2359 }
 0xc3d   :  { %v580_v31 = vmul.f32 %v2360_v28, %v487_v15 }
 0xca0   :  { %v583_v29 = vpop.permute.xlu0 %582 }
 0xca1   :  { %v585_v30 = vmul.f32 %v2360_v28, %v583_v29  ;;  %v920_v29 = vld [vmem:[#allocation9 + $0x8] sm:$0xff] }
 0xca3   :  { %587 = vrot.lane.b32.xlu1 %v585_v30, %s2625_s26 }
 0xd15   :  { %v588_v32 = vpop.permute.xlu1 %587 }
 0xd16   :  { %v590_v33 = vadd.f32 %v588_v32, %v580_v31  ;;  %v921_v31 = vld [vmem:[#allocation9 + $0x10] sm:$0xff]  ;;  %v922_v32 = vld [vmem:[#allocation9 + $0x18] sm:$0xff] }
 0xd18   :  { %2361 = vtanh.f32 %v590_v33 }
 0xd22   :  { %v2362_v34 = vpop.eup %2361 }
 0xd23   :  { %593 = vrot.lane.b32.xlu0 %v2362_v34, %s2624_s3  ;;  %v1013_v34 = vld [vmem:[#allocation10] sm:$0xff] }
 0xd95   :  { %v594_v35 = vpop.permute.xlu0 %593 }
 0xd96   :  { %v596_v36 = vmul.f32 %v2360_v28, %v594_v35  ;;  %v919_v28 = vld [vmem:[#allocation9] sm:$0xff]  ;;  %v1014_v35 = vld [vmem:[#allocation10 + $0x8] sm:$0xff] }
 0xd97   :  { %v2251_v30 = vpack.c.bf16 %v920_v29, %v919_v28 }
 0xd98   :  { %598 = vrot.lane.b32.xlu1 %v596_v36, %s2625_s26  ;;  %v1015_v36 = vld [vmem:[#allocation10 + $0x10] sm:$0xff] }
 0xd99   :  { %2252 = vmatprep.subr.bf16.mxu0 %v2251_v30 }
 0xe0a   :  { %v599_v37 = vpop.permute.xlu1 %598 }
 0xe0b   :  { %601 = vst.msk [vmem:[#allocation2 + $0x8] sm:$0x3] %vm188_vm1, %v599_v37  ;;  %2080 = vmatmul.mubr.msk.f32.vlgmr.msra.gmra.mrb[4].mxu1 %vm85_vm2, %v599_v37  ;;  %v2851_v37 = vpack.c.bf16 %v1014_v35, %v1013_v34 }
 0xe0c   :  { %2247 = vmatpush3.bf16.msra.mxu1 %v2751_v5  ;;  %2101 = vmatprep.mubr.msk.f32.mxu1 %vm2622_vm0, %v2623_v1 }
 0xe0d   :  { %2248 = vmatprep.subr.bf16.mxu1 %v2621_v0 }
 0xe10   :  { %2250 = vmatpush3.bf16.msra.mxu1 %v2754_v7 }
 0xe11   :  { %2259 = vmatprep.subr.bf16.mxu1 %v2621_v0 }
 0xede   :  { %v671_v39 = vpop.f32.mrb[4].mxu1 }
 0xedf   :  { %v675_v40 = vadd.f32 %v671_v39, %v602_v38  ;;  %v2081_v41 = vpop.f32.mrb[5].mxu1  ;;  %v1016_v38 = vld [vmem:[#allocation10 + $0x18] sm:$0xff] }
 0xee0   :  { %v2854_v41 = vpack.c.bf16 %v1016_v38, %v1015_v36 }
 0xee1   :  { %2363 = vtanh.f32 %v675_v40  ;;  %v1907_v43 = vmul.f32 -1.442695, %v675_v40 }
 0xee3   :  { %2365 = vpow2.f32 %v1907_v43 }
 0xeeb   :  { %v2364_v42 = vpop.eup %2363 }
 0xeec   :  { %685 = vrot.lane.b32.xlu0 %v2364_v42, %s2624_s3 }
 0xeed   :  { %v2366_v5 = vpop.eup %2365 }
 0xeee   :  { %v679_v44 = vadd.f32 1.0, %v2366_v5 }
 0xef0   :  { %2367 = vrcp.f32 %v679_v44 }
 0xefa   :  { %v2368_v45 = vpop.eup %2367 }
 0xefb   :  { %v683_v7 = vmul.f32 %v2368_v45, %v590_v33  ;;  %v2255_v33 = vpack.c.bf16 %v922_v32, %v921_v31 }
 0xf5e   :  { %v686_v46 = vpop.permute.xlu0 %685 }
 0xf5f   :  { %v688_v47 = vmul.f32 %v2368_v45, %v686_v46 }
 0xf61   :  { %690 = vrot.lane.b32.xlu1 %v688_v47, %s2625_s26 }
 0xfd3   :  { %v691_v48 = vpop.permute.xlu1 %690 }
 0xfd4   :  { %v693_v49 = vadd.f32 %v691_v48, %v683_v7 }
 0xfd6   :  { %2369 = vtanh.f32 %v693_v49 }
 0xfe0   :  { %v2370_v50 = vpop.eup %2369 }
 0xfe1   :  { %696 = vrot.lane.b32.xlu0 %v2370_v50, %s2624_s3 }
0x1053   :  { %v697_v51 = vpop.permute.xlu0 %696 }
0x1054   :  { %v699_v52 = vmul.f32 %v2368_v45, %v697_v51  ;;  %v1912_v45 = vld [vmem:[%s3021_s4] ss:$0 sm:$0xff]  ;;  %s2626_s4 = smov 96  }
0x1056   :  { %701 = vrot.lane.b32.xlu1 %v699_v52, %s2625_s26 }
0x10c8   :  { %v702_v53 = vpop.permute.xlu1 %701 }
0x10c9   :  { %704 = vst.msk [vmem:[#allocation2 + $0xa] sm:$0x3] %vm188_vm1, %v702_v53  ;;  %2091 = vmatmul.mubr.msk.f32.vlgmr.msra.gmra.mrb[6].mxu0 %vm85_vm2, %v702_v53 }
0x10ca   :  { %2112 = vmatprep.mubr.msk.f32.mxu0 %vm85_vm2, %v917_v54  ;;  %2254 = vmatpush3.bf16.msra.mxu0 %v2251_v30 }
0x10cb   :  { %2256 = vmatprep.subr.bf16.mxu0 %v2255_v33 }
0x10ce   :  { %2258 = vmatpush3.bf16.msra.mxu0 %v2255_v33 }
0x10cf   :  { %2265 = vmatprep.subr.bf16.mxu0 %v2621_v0 }
0x119c   :  { %v774_v56 = vpop.f32.mrb[6].mxu0 }
0x119d   :  { %v778_v57 = vadd.f32 %v774_v56, %v705_v55  ;;  %v2092_v58 = vpop.f32.mrb[7].mxu0 }
0x119f   :  { %2371 = vtanh.f32 %v778_v57  ;;  %v1909_v60 = vmul.f32 -1.442695, %v778_v57 }
0x11a1   :  { %2373 = vpow2.f32 %v1909_v60 }
0x11a9   :  { %v2372_v59 = vpop.eup %2371 }
0x11aa   :  { %788 = vrot.lane.b32.xlu0 %v2372_v59, %s2624_s3 }
0x11ab   :  { %v2374_v61 = vpop.eup %2373 }
0x11ac   :  { %v782_v62 = vadd.f32 1.0, %v2374_v61 }
0x11ae   :  { %2375 = vrcp.f32 %v782_v62 }
0x11b8   :  { %v2376_v63 = vpop.eup %2375 }
0x11b9   :  { %v786_v4 = vmul.f32 %v2376_v63, %v693_v49 }
0x121c   :  { %v789_v2 = vpop.permute.xlu0 %788 }
0x121d   :  { %v791_v3 = vmul.f32 %v2376_v63, %v789_v2 }
0x121f   :  { %793 = vrot.lane.b32.xlu1 %v791_v3, %s2625_s26 }
0x1291   :  { %v794_v6 = vpop.permute.xlu1 %793 }
0x1292   :  { %v796_v8 = vadd.f32 %v794_v6, %v786_v4 }
0x1294   :  { %2377 = vtanh.f32 %v796_v8 }
0x129e   :  { %v2378_v9 = vpop.eup %2377 }
0x129f   :  { %799 = vrot.lane.b32.xlu0 %v2378_v9, %s2624_s3 }
0x1311   :  { %v800_v10 = vpop.permute.xlu0 %799 }
0x1312   :  { %v802_v11 = vmul.f32 %v2376_v63, %v800_v10 }
0x1314   :  { %804 = vrot.lane.b32.xlu1 %v802_v11, %s2625_s26 }
0x1386   :  { %v805_v12 = vpop.permute.xlu1 %804 }
0x1387   :  { %807 = vst.msk [vmem:[#allocation2 + $0xc] sm:$0x3] %vm188_vm1, %v805_v12  ;;  %2102 = vmatmul.mubr.msk.f32.vlgmr.msra.gmra.mrb[6].mxu1 %vm85_vm2, %v805_v12 }
0x1388   :  { %2123 = vmatprep.mubr.msk.f32.mxu1 %vm2622_vm0, %v2623_v1  ;;  %2261 = vmatpush3.bf16.msra.mxu1 %v2851_v37 }
0x1389   :  { %2262 = vmatprep.subr.bf16.mxu1 %v2621_v0 }
0x138c   :  { %2264 = vmatpush3.bf16.msra.mxu1 %v2854_v41 }
0x138d   :  { %2271 = vmatprep.subr.bf16.mxu1 %v2621_v0 }
0x138f   :  { %2124 = vmatmul.mubr.f32.vlgmr.msra.gmra.mrb[8].mxu1 %v2623_v1 }
0x1390   :  { %2273 = vmatpush3.bf16.msra.mxu1 %v2851_v37  ;;  %2145 = vmatprep.mubr.msk.f32.mxu1 %vm2622_vm0, %v2623_v1 }
0x1391   :  { %2274 = vmatprep.subr.bf16.mxu1 %v2621_v0 }
0x1394   :  { %2276 = vmatpush3.bf16.msra.mxu1 %v2854_v41 }
0x1395   :  { %2283 = vmatprep.subr.bf16.mxu1 %v2621_v0 }
0x145a   :  { %v877_v14 = vpop.f32.mrb[6].mxu1 }
0x145b   :  { %v881_v15 = vadd.f32 %v877_v14, %v808_v13  ;;  %v2103_v16 = vpop.f32.mrb[7].mxu1 }
0x145d   :  { %2379 = vtanh.f32 %v881_v15  ;;  %v1911_v18 = vmul.f32 -1.442695, %v881_v15 }
0x145f   :  { %2381 = vpow2.f32 %v1911_v18 }
0x1462   :  { %v1084_v5 = vpop.f32.mrb[8].mxu1 }
0x1463   :  { %v2125_v44 = vpop.f32.mrb[9].mxu1 }
0x1467   :  { %v2380_v17 = vpop.eup %2379 }
0x1468   :  { %891 = vrot.lane.b32.xlu0 %v2380_v17, %s2624_s3 }
0x1469   :  { %v2382_v19 = vpop.eup %2381 }
0x146a   :  { %v885_v20 = vadd.f32 1.0, %v2382_v19 }
0x146c   :  { %2383 = vrcp.f32 %v885_v20 }
0x1476   :  { %v2384_v21 = vpop.eup %2383 }
0x1477   :  { %v889_v24 = vmul.f32 %v2384_v21, %v796_v8 }
0x14da   :  { %v892_v22 = vpop.permute.xlu0 %891 }
0x14db   :  { %v894_v23 = vmul.f32 %v2384_v21, %v892_v22 }
0x14dd   :  { %896 = vrot.lane.b32.xlu1 %v894_v23, %s2625_s26 }
0x154f   :  { %v897_v25 = vpop.permute.xlu1 %896 }
0x1550   :  { %v2846_v26 = vadd.f32 %v897_v25, %v889_v24 }
0x1552   :  { %2385 = vtanh.f32 %v2846_v26 }
0x155c   :  { %v2386_v27 = vpop.eup %2385 }
0x155d   :  { %902 = vrot.lane.b32.xlu0 %v2386_v27, %s2624_s3 }
0x15cf   :  { %v903_v39 = vpop.permute.xlu0 %902 }
0x15d0   :  { %v905_v40 = vmul.f32 %v2384_v21, %v903_v39 }
0x15d2   :  { %907 = vrot.lane.b32.xlu1 %v905_v40, %s2625_s26 }
0x1644   :  { %v908_v42 = vpop.permute.xlu1 %907 }
0x1645   :  { %910 = vst.msk [vmem:[#allocation2 + $0xe] sm:$0x3] %vm188_vm1, %v908_v42  ;;  %911 = vst.msk [vmem:[#allocation13] sm:$0x3] %vm188_vm1, %v908_v42 }
0x164c   :  { %v918_v43 = vld [vmem:[#allocation2 + $0x8] sm:$0xff] }
0x164d   :  { %2113 = vmatmul.mubr.msk.f32.vlgmr.msra.gmra.mrb[8].mxu0 %vm85_vm2, %v918_v43 }
0x164e   :  { %2267 = vmatpush3.bf16.msra.mxu0 %v2851_v37  ;;  %2134 = vmatprep.mubr.msk.f32.mxu0 %vm2622_vm0, %v2623_v1 }
0x164f   :  { %2268 = vmatprep.subr.bf16.mxu0 %v2621_v0 }
0x1652   :  { %2270 = vmatpush3.bf16.msra.mxu0 %v2854_v41 }
0x1653   :  { %2277 = vmatprep.subr.bf16.mxu0 %v2621_v0 }
0x1720   :  { %v2114_v46 = vpop.f32.mrb[8].mxu0 }
0x1721   :  { %v1008_v47 = vadd.f32 %v2114_v46, %v1912_v45  ;;  %v1002_v7 = vpop.f32.mrb[9].mxu0 }
0x1722   :  { %v1003_v48 = vadd.f32 %v1912_v45, %v1002_v7 }
0x1723   :  { %1012 = vst [vmem:[#allocation3 + $0x8] sm:$0xff] %v1008_v47 }
0x1724   :  { %1011 = vst [vmem:[#allocation3] sm:$0xff] %v1003_v48 }
0x172b   :  { %v1017_v49 = vld [vmem:[#allocation3] sm:$0x3]  ;;  %v1118_v3 = vld [vmem:[#allocation3 + $0x2] sm:$0x3]  ;;  %v1221_v23 = vld [vmem:[#allocation3 + $0x4] sm:$0x3] }
0x172c   :  { %v1088_v50 = vadd.f32 %v1084_v5, %v1017_v49  ;;  %v1324_v5 = vld [vmem:[#allocation3 + $0x6] sm:$0x3] }
0x172e   :  { %2387 = vtanh.f32 %v1088_v50  ;;  %v1915_v52 = vmul.f32 -1.442695, %v1088_v50 }
0x1730   :  { %2389 = vpow2.f32 %v1915_v52 }
0x1738   :  { %v2388_v51 = vpop.eup %2387 }
0x1739   :  { %1098 = vrot.lane.b32.xlu0 %v2388_v51, %s2624_s3 }
0x173a   :  { %v2390_v53 = vpop.eup %2389 }
0x173b   :  { %v1092_v54 = vadd.f32 1.0, %v2390_v53 }
0x173d   :  { %2391 = vrcp.f32 %v1092_v54 }
0x1747   :  { %v2392_v55 = vpop.eup %2391 }
0x1748   :  { %v1096_v58 = vmul.f32 0.0, %v2392_v55 }
0x17ab   :  { %v1099_v56 = vpop.permute.xlu0 %1098 }
0x17ac   :  { %v1101_v57 = vmul.f32 %v2392_v55, %v1099_v56 }
0x17ae   :  { %1103 = vrot.lane.b32.xlu1 %v1101_v57, %s2625_s26 }
0x1820   :  { %v1104_v59 = vpop.permute.xlu1 %1103 }
0x1821   :  { %v1106_v60 = vadd.f32 %v1104_v59, %v1096_v58 }
0x1823   :  { %2393 = vtanh.f32 %v1106_v60 }
0x182d   :  { %v2394_v61 = vpop.eup %2393 }
0x182e   :  { %1109 = vrot.lane.b32.xlu0 %v2394_v61, %s2624_s3 }
0x18a0   :  { %v1110_v62 = vpop.permute.xlu0 %1109 }
0x18a1   :  { %v1112_v63 = vmul.f32 %v2392_v55, %v1110_v62 }
0x18a3   :  { %1114 = vrot.lane.b32.xlu1 %v1112_v63, %s2625_s26 }
0x1915   :  { %v1115_v2 = vpop.permute.xlu1 %1114 }
0x1916   :  { %1117 = vst.msk [vmem:[#allocation12] sm:$0x3] %vm188_vm1, %v1115_v2  ;;  %2135 = vmatmul.mubr.msk.f32.vlgmr.msra.gmra.mrb[10].mxu0 %vm85_vm2, %v1115_v2 }
0x1917   :  { %2279 = vmatpush3.bf16.msra.mxu0 %v2851_v37  ;;  %2156 = vmatprep.mubr.msk.f32.mxu0 %vm2622_vm0, %v2623_v1 }
0x1918   :  { %2280 = vmatprep.subr.bf16.mxu0 %v2621_v0 }
0x191b   :  { %2282 = vmatpush3.bf16.msra.mxu0 %v2854_v41 }
0x191c   :  { %2289 = vmatprep.subr.bf16.mxu0 %v2621_v0 }
0x19e9   :  { %v1187_v4 = vpop.f32.mrb[10].mxu0 }
0x19ea   :  { %v1191_v6 = vadd.f32 %v1187_v4, %v1118_v3  ;;  %v2136_v8 = vpop.f32.mrb[11].mxu0 }
0x19ec   :  { %2395 = vtanh.f32 %v1191_v6  ;;  %v1917_v10 = vmul.f32 -1.442695, %v1191_v6 }
0x19ee   :  { %2397 = vpow2.f32 %v1917_v10 }
0x19f6   :  { %v2396_v9 = vpop.eup %2395 }
0x19f7   :  { %1201 = vrot.lane.b32.xlu0 %v2396_v9, %s2624_s3 }
0x19f8   :  { %v2398_v11 = vpop.eup %2397 }
0x19f9   :  { %v1195_v12 = vadd.f32 1.0, %v2398_v11 }
0x19fb   :  { %2399 = vrcp.f32 %v1195_v12 }
0x1a05   :  { %v2400_v13 = vpop.eup %2399 }
0x1a06   :  { %v1199_v16 = vmul.f32 %v2400_v13, %v1106_v60  ;;  %v1427_v60 = vld [vmem:[#allocation3 + $0x8] sm:$0x3] }
0x1a69   :  { %v1202_v14 = vpop.permute.xlu0 %1201 }
0x1a6a   :  { %v1204_v15 = vmul.f32 %v2400_v13, %v1202_v14 }
0x1a6c   :  { %1206 = vrot.lane.b32.xlu1 %v1204_v15, %s2625_s26 }
0x1ade   :  { %v1207_v17 = vpop.permute.xlu1 %1206 }
0x1adf   :  { %v1209_v18 = vadd.f32 %v1207_v17, %v1199_v16 }
0x1ae1   :  { %2401 = vtanh.f32 %v1209_v18 }
0x1aeb   :  { %v2402_v19 = vpop.eup %2401 }
0x1aec   :  { %1212 = vrot.lane.b32.xlu0 %v2402_v19, %s2624_s3 }
0x1b5e   :  { %v1213_v20 = vpop.permute.xlu0 %1212 }
0x1b5f   :  { %v1215_v21 = vmul.f32 %v2400_v13, %v1213_v20 }
0x1b61   :  { %1217 = vrot.lane.b32.xlu1 %v1215_v21, %s2625_s26 }
0x1bd3   :  { %v1218_v22 = vpop.permute.xlu1 %1217 }
0x1bd4   :  { %1220 = vst.msk [vmem:[#allocation12 + $0x2] sm:$0x3] %vm188_vm1, %v1218_v22  ;;  %2146 = vmatmul.mubr.msk.f32.vlgmr.msra.gmra.mrb[10].mxu1 %vm85_vm2, %v1218_v22 }
0x1bd5   :  { %2285 = vmatpush3.bf16.msra.mxu1 %v2851_v37  ;;  %2167 = vmatprep.mubr.msk.f32.mxu1 %vm2622_vm0, %v2623_v1 }
0x1bd6   :  { %2286 = vmatprep.subr.bf16.mxu1 %v2621_v0 }
0x1bd9   :  { %2288 = vmatpush3.bf16.msra.mxu1 %v2854_v41 }
0x1bda   :  { %2295 = vmatprep.subr.bf16.mxu1 %v2621_v0 }
0x1ca7   :  { %v1290_v24 = vpop.f32.mrb[10].mxu1 }
0x1ca8   :  { %v1294_v25 = vadd.f32 %v1290_v24, %v1221_v23  ;;  %v2147_v27 = vpop.f32.mrb[11].mxu1 }
0x1caa   :  { %2403 = vtanh.f32 %v1294_v25  ;;  %v1919_v29 = vmul.f32 -1.442695, %v1294_v25 }
0x1cac   :  { %2405 = vpow2.f32 %v1919_v29 }
0x1cb4   :  { %v2404_v28 = vpop.eup %2403 }
0x1cb5   :  { %1304 = vrot.lane.b32.xlu0 %v2404_v28, %s2624_s3 }
0x1cb6   :  { %v2406_v30 = vpop.eup %2405 }
0x1cb7   :  { %v1298_v31 = vadd.f32 1.0, %v2406_v30 }
0x1cb9   :  { %2407 = vrcp.f32 %v1298_v31 }
0x1cc3   :  { %v2408_v32 = vpop.eup %2407 }
0x1cc4   :  { %v1302_v35 = vmul.f32 %v2408_v32, %v1209_v18  ;;  %v1530_v18 = vld [vmem:[#allocation3 + $0xa] sm:$0x3] }
0x1d27   :  { %v1305_v33 = vpop.permute.xlu0 %1304 }
0x1d28   :  { %v1307_v34 = vmul.f32 %v2408_v32, %v1305_v33  ;;  %v1633_v33 = vld [vmem:[#allocation3 + $0xc] sm:$0x3] }
0x1d2a   :  { %1309 = vrot.lane.b32.xlu1 %v1307_v34, %s2625_s26 }
0x1d9c   :  { %v1310_v36 = vpop.permute.xlu1 %1309 }
0x1d9d   :  { %v1312_v38 = vadd.f32 %v1310_v36, %v1302_v35 }
0x1d9f   :  { %2409 = vtanh.f32 %v1312_v38 }
0x1da9   :  { %v2410_v39 = vpop.eup %2409 }
0x1daa   :  { %1315 = vrot.lane.b32.xlu0 %v2410_v39, %s2624_s3 }
0x1e1c   :  { %v1316_v40 = vpop.permute.xlu0 %1315 }
0x1e1d   :  { %v1318_v42 = vmul.f32 %v2408_v32, %v1316_v40 }
0x1e1f   :  { %1320 = vrot.lane.b32.xlu1 %v1318_v42, %s2625_s26 }
0x1e91   :  { %v1321_v43 = vpop.permute.xlu1 %1320 }
0x1e92   :  { %1323 = vst.msk [vmem:[#allocation12 + $0x4] sm:$0x3] %vm188_vm1, %v1321_v43  ;;  %2157 = vmatmul.mubr.msk.f32.vlgmr.msra.gmra.mrb[12].mxu0 %vm85_vm2, %v1321_v43 }
0x1e93   :  { %2291 = vmatpush3.bf16.msra.mxu0 %v2851_v37  ;;  %2178 = vmatprep.mubr.msk.f32.mxu0 %vm2622_vm0, %v2623_v1 }
0x1e94   :  { %2292 = vmatprep.subr.bf16.mxu0 %v2621_v0 }
0x1e97   :  { %2294 = vmatpush3.bf16.msra.mxu0 %v2854_v41 }
0x1e98   :  { %2301 = vmatprep.subr.bf16.mxu0 %v2621_v0 }
0x1f65   :  { %v1393_v44 = vpop.f32.mrb[12].mxu0 }
0x1f66   :  { %v1397_v45 = vadd.f32 %v1393_v44, %v1324_v5  ;;  %v2158_v46 = vpop.f32.mrb[13].mxu0 }
0x1f68   :  { %2411 = vtanh.f32 %v1397_v45  ;;  %v1921_v7 = vmul.f32 -1.442695, %v1397_v45 }
0x1f6a   :  { %2413 = vpow2.f32 %v1921_v7 }
0x1f72   :  { %v2412_v47 = vpop.eup %2411 }
0x1f73   :  { %1407 = vrot.lane.b32.xlu0 %v2412_v47, %s2624_s3 }
0x1f74   :  { %v2414_v48 = vpop.eup %2413 }
0x1f75   :  { %v1401_v49 = vadd.f32 1.0, %v2414_v48 }
0x1f77   :  { %2415 = vrcp.f32 %v1401_v49 }
0x1f81   :  { %v2416_v50 = vpop.eup %2415 }
0x1f82   :  { %v1405_v53 = vmul.f32 %v2416_v50, %v1312_v38 }
0x1fe5   :  { %v1408_v51 = vpop.permute.xlu0 %1407 }
0x1fe6   :  { %v1410_v52 = vmul.f32 %v2416_v50, %v1408_v51  ;;  %v1736_v51 = vld [vmem:[#allocation3 + $0xe] sm:$0x3] }
0x1fe8   :  { %1412 = vrot.lane.b32.xlu1 %v1410_v52, %s2625_s26 }
0x205a   :  { %v1413_v54 = vpop.permute.xlu1 %1412 }
0x205b   :  { %v1415_v55 = vadd.f32 %v1413_v54, %v1405_v53 }
0x205d   :  { %2417 = vtanh.f32 %v1415_v55 }
0x2067   :  { %v2418_v56 = vpop.eup %2417 }
0x2068   :  { %1418 = vrot.lane.b32.xlu0 %v2418_v56, %s2624_s3 }
0x20da   :  { %v1419_v57 = vpop.permute.xlu0 %1418 }
0x20db   :  { %v1421_v58 = vmul.f32 %v2416_v50, %v1419_v57 }
0x20dd   :  { %1423 = vrot.lane.b32.xlu1 %v1421_v58, %s2625_s26 }
0x214f   :  { %v1424_v59 = vpop.permute.xlu1 %1423 }
0x2150   :  { %1426 = vst.msk [vmem:[#allocation12 + $0x6] sm:$0x3] %vm188_vm1, %v1424_v59  ;;  %2168 = vmatmul.mubr.msk.f32.vlgmr.msra.gmra.mrb[12].mxu1 %vm85_vm2, %v1424_v59 }
0x2151   :  { %2297 = vmatpush3.bf16.msra.mxu1 %v2851_v37  ;;  %2189 = vmatprep.mubr.msk.f32.mxu1 %vm2622_vm0, %v2623_v1 }
0x2152   :  { %2298 = vmatprep.subr.bf16.mxu1 %v2621_v0 }
0x2155   :  { %2300 = vmatpush3.bf16.msra.mxu1 %v2854_v41 }
0x2223   :  { %v1496_v61 = vpop.f32.mrb[12].mxu1 }
0x2224   :  { %v1500_v62 = vadd.f32 %v1496_v61, %v1427_v60  ;;  %v2169_v63 = vpop.f32.mrb[13].mxu1 }
0x2226   :  { %2419 = vtanh.f32 %v1500_v62  ;;  %v1923_v3 = vmul.f32 -1.442695, %v1500_v62 }
0x2228   :  { %2421 = vpow2.f32 %v1923_v3 }
0x2230   :  { %v2420_v2 = vpop.eup %2419 }
0x2231   :  { %1510 = vrot.lane.b32.xlu0 %v2420_v2, %s2624_s3 }
0x2232   :  { %v2422_v4 = vpop.eup %2421 }
0x2233   :  { %v1504_v6 = vadd.f32 1.0, %v2422_v4 }
0x2235   :  { %2423 = vrcp.f32 %v1504_v6 }
0x223f   :  { %v2424_v8 = vpop.eup %2423 }
0x2240   :  { %v1508_v11 = vmul.f32 %v2424_v8, %v1415_v55 }
0x22a3   :  { %v1511_v9 = vpop.permute.xlu0 %1510 }
0x22a4   :  { %v1513_v10 = vmul.f32 %v2424_v8, %v1511_v9 }
0x22a6   :  { %1515 = vrot.lane.b32.xlu1 %v1513_v10, %s2625_s26 }
0x2318   :  { %v1516_v12 = vpop.permute.xlu1 %1515 }
0x2319   :  { %v1518_v13 = vadd.f32 %v1516_v12, %v1508_v11 }
0x231b   :  { %2425 = vtanh.f32 %v1518_v13 }
0x2325   :  { %v2426_v14 = vpop.eup %2425 }
0x2326   :  { %1521 = vrot.lane.b32.xlu0 %v2426_v14, %s2624_s3 }
0x2398   :  { %v1522_v15 = vpop.permute.xlu0 %1521 }
0x2399   :  { %v1524_v16 = vmul.f32 %v2424_v8, %v1522_v15 }
0x239b   :  { %1526 = vrot.lane.b32.xlu1 %v1524_v16, %s2625_s26 }
0x240d   :  { %v1527_v17 = vpop.permute.xlu1 %1526 }
0x240e   :  { %1529 = vst.msk [vmem:[#allocation12 + $0x8] sm:$0x3] %vm188_vm1, %v1527_v17  ;;  %2179 = vmatmul.mubr.msk.f32.vlgmr.msra.gmra.mrb[14].mxu0 %vm85_vm2, %v1527_v17 }
0x240f   :  { %2303 = vmatpush3.bf16.msra.mxu0 %v2851_v37  ;;  %2200 = vmatprep.mubr.msk.f32.mxu0 %vm2622_vm0, %v2623_v1 }
0x2410   :  { %2304 = vmatprep.subr.bf16.mxu0 %v2621_v0 }
0x2413   :  { %2306 = vmatpush3.bf16.msra.mxu0 %v2854_v41 }
0x24e1   :  { %v1599_v19 = vpop.f32.mrb[14].mxu0 }
0x24e2   :  { %v1603_v20 = vadd.f32 %v1599_v19, %v1530_v18  ;;  %v2180_v21 = vpop.f32.mrb[15].mxu0 }
0x24e4   :  { %2427 = vtanh.f32 %v1603_v20  ;;  %v1925_v23 = vmul.f32 -1.442695, %v1603_v20 }
0x24e6   :  { %2429 = vpow2.f32 %v1925_v23 }
0x24ee   :  { %v2428_v22 = vpop.eup %2427 }
0x24ef   :  { %1613 = vrot.lane.b32.xlu0 %v2428_v22, %s2624_s3 }
0x24f0   :  { %v2430_v24 = vpop.eup %2429 }
0x24f1   :  { %v1607_v25 = vadd.f32 1.0, %v2430_v24 }
0x24f3   :  { %2431 = vrcp.f32 %v1607_v25 }
0x24fd   :  { %v2432_v37 = vpop.eup %2431 }
0x24fe   :  { %v1611_v0 = vmul.f32 %v2432_v37, %v1518_v13 }
0x2561   :  { %v1614_v27 = vpop.permute.xlu0 %1613 }
0x2562   :  { %v1616_v1 = vmul.f32 %v2432_v37, %v1614_v27 }
0x2564   :  { %1618 = vrot.lane.b32.xlu1 %v1616_v1, %s2625_s26 }
0x25d6   :  { %v1619_v41 = vpop.permute.xlu1 %1618 }
0x25d7   :  { %v1621_v28 = vadd.f32 %v1619_v41, %v1611_v0 }
0x25d9   :  { %2433 = vtanh.f32 %v1621_v28 }
0x25e3   :  { %v2434_v29 = vpop.eup %2433 }
0x25e4   :  { %1624 = vrot.lane.b32.xlu0 %v2434_v29, %s2624_s3 }
0x2656   :  { %v1625_v30 = vpop.permute.xlu0 %1624 }
0x2657   :  { %v1627_v31 = vmul.f32 %v2432_v37, %v1625_v30 }
0x2659   :  { %1629 = vrot.lane.b32.xlu1 %v1627_v31, %s2625_s26 }
0x26cb   :  { %v1630_v32 = vpop.permute.xlu1 %1629 }
0x26cc   :  { %1632 = vst.msk [vmem:[#allocation12 + $0xa] sm:$0x3] %vm188_vm1, %v1630_v32  ;;  %2190 = vmatmul.mubr.msk.f32.vlgmr.msra.gmra.mrb[14].mxu1 %vm85_vm2, %v1630_v32 }
0x279f   :  { %v1702_v34 = vpop.f32.mrb[14].mxu1 }
0x27a0   :  { %v1706_v35 = vadd.f32 %v1702_v34, %v1633_v33  ;;  %v2191_v36 = vpop.f32.mrb[15].mxu1 }
0x27a2   :  { %2435 = vtanh.f32 %v1706_v35  ;;  %v1927_v39 = vmul.f32 -1.442695, %v1706_v35 }
0x27a4   :  { %2437 = vpow2.f32 %v1927_v39 }
0x27ac   :  { %v2436_v38 = vpop.eup %2435 }
0x27ad   :  { %1716 = vrot.lane.b32.xlu0 %v2436_v38, %s2624_s3 }
0x27ae   :  { %v2438_v40 = vpop.eup %2437 }
0x27af   :  { %v1710_v42 = vadd.f32 1.0, %v2438_v40 }
0x27b1   :  { %2439 = vrcp.f32 %v1710_v42 }
0x27bb   :  { %v2440_v43 = vpop.eup %2439 }
0x27bc   :  { %v1714_v45 = vmul.f32 %v2440_v43, %v1621_v28 }
0x281f   :  { %v1717_v5 = vpop.permute.xlu0 %1716 }
0x2820   :  { %v1719_v44 = vmul.f32 %v2440_v43, %v1717_v5 }
0x2822   :  { %1721 = vrot.lane.b32.xlu1 %v1719_v44, %s2625_s26 }
0x2894   :  { %v1722_v46 = vpop.permute.xlu1 %1721 }
0x2895   :  { %v1724_v47 = vadd.f32 %v1722_v46, %v1714_v45 }
0x2897   :  { %2441 = vtanh.f32 %v1724_v47 }
0x28a1   :  { %v2442_v7 = vpop.eup %2441 }
0x28a2   :  { %1727 = vrot.lane.b32.xlu0 %v2442_v7, %s2624_s3 }
0x2914   :  { %v1728_v48 = vpop.permute.xlu0 %1727 }
0x2915   :  { %v1730_v49 = vmul.f32 %v2440_v43, %v1728_v48 }
0x2917   :  { %1732 = vrot.lane.b32.xlu1 %v1730_v49, %s2625_s26 }
0x2989   :  { %v1733_v50 = vpop.permute.xlu1 %1732 }
0x298a   :  { %1735 = vst.msk [vmem:[#allocation12 + $0xc] sm:$0x3] %vm188_vm1, %v1733_v50  ;;  %2201 = vmatmul.mubr.msk.f32.vlgmr.msra.gmra.mrb[16].mxu0 %vm85_vm2, %v1733_v50 }
0x2a5d   :  { %v1805_v52 = vpop.f32.mrb[16].mxu0 }
0x2a5e   :  { %v1809_v53 = vadd.f32 %v1805_v52, %v1736_v51  ;;  %v2202_v54 = vpop.f32.mrb[17].mxu0 }
0x2a60   :  { %2443 = vtanh.f32 %v1809_v53  ;;  %v1929_v56 = vmul.f32 -1.442695, %v1809_v53 }
0x2a62   :  { %2445 = vpow2.f32 %v1929_v56 }
0x2a6a   :  { %v2444_v55 = vpop.eup %2443 }
0x2a6b   :  { %1819 = vrot.lane.b32.xlu0 %v2444_v55, %s2624_s3 }
0x2a6c   :  { %v2446_v57 = vpop.eup %2445 }
0x2a6d   :  { %v1813_v58 = vadd.f32 1.0, %v2446_v57 }
0x2a6f   :  { %2447 = vrcp.f32 %v1813_v58 }
0x2a79   :  { %v2448_v59 = vpop.eup %2447 }
0x2a7a   :  { %v1817_v62 = vmul.f32 %v2448_v59, %v1724_v47 }
0x2add   :  { %v1820_v60 = vpop.permute.xlu0 %1819 }
0x2ade   :  { %v1822_v61 = vmul.f32 %v2448_v59, %v1820_v60 }
0x2ae0   :  { %1824 = vrot.lane.b32.xlu1 %v1822_v61, %s2625_s26 }
0x2b52   :  { %v1825_v63 = vpop.permute.xlu1 %1824 }
0x2b53   :  { %v1827_v2 = vadd.f32 %v1825_v63, %v1817_v62 }
0x2b55   :  { %2449 = vtanh.f32 %v1827_v2 }
0x2b5f   :  { %v2450_v3 = vpop.eup %2449 }
0x2b60   :  { %1830 = vrot.lane.b32.xlu0 %v2450_v3, %s2624_s3 }
0x2b64   :  { %913 = vrot.lane.b32.xlu0 %v2846_v26, %s2626_s4 }
0x2bd2   :  { %v1831_v4 = vpop.permute.xlu0 %1830 }
0x2bd3   :  { %v1833_v6 = vmul.f32 %v2448_v59, %v1831_v4 }
0x2bd5   :  { %1835 = vrot.lane.b32.xlu1 %v1833_v6, %s2625_s26 }
0x2bd6   :  { %v914_v8 = vpop.permute.xlu0 %913 }
0x2bd7   :  { %916 = vst.msk [vmem:[#allocation15] sm:$0x3] %vm188_vm1, %v914_v8 }
0x2bd9   :  { %1842 = vrot.lane.b32.xlu1 %v1827_v2, %s2626_s4 }
0x2c47   :  { %v1836_v9 = vpop.permute.xlu1 %1835 }
0x2c48   :  { %1838 = vst.msk [vmem:[#allocation12 + $0xe] sm:$0x3] %vm188_vm1, %v1836_v9  ;;  %1840 = vst.msk [vmem:[#allocation13 + $0x2] sm:$0x3] %vm188_vm1, %v1836_v9 }
0x2c49   :  { %2550 = shalt.err (!%p2547_p8)
}
0x2c4a   :  { %s2551_s27 = scalar_lea.hbm %s3023_s6, 64 }
0x2c4b   :  { %p2552_p9 = scmp.ne.s32.totalorder %s3023_s6, %s2551_s27  ;;  %p2555_p10 = scmp.lt.u32.totalorder %s2551_s27, %s3023_s6 }
0x2c4d   :  { %p2557_p11 = pnand %p2555_p10, %p2552_p9 }
0x2c4f   :  { %2560 = shalt.err (!%p2557_p11)
}
0x2c50   :  { %s2630_s21 = smov 2   ;;  %s2561_s24 = scalar_lea.vmem %s2955_s10, 256 }
0x2c51   :  { %1870 = dma.vmem_to_hbm [thread:$0]  %s1865_s8, 64, %s3023_s6, [#allocation14], %s2625_s26, %s2625_s26, %s2630_s21  }
0x2c52   :  { %p2562_p12 = scmp.ne.s32.totalorder %s2955_s10, %s2561_s24  ;;  %p2566_p13 = scmp.lt.s32.totalorder %s2955_s10, %s2955_s10 }
0x2c53   :  { %p2567_p0 = scmp.lt.s32.totalorder %s2561_s24, %s2561_s24 }
0x2c55   :  { %p2568_p1 = por %p2567_p0, %p2566_p13 }
0x2c57   :  { %p2569_p2 = pnand %p2568_p1, %p2562_p12 }
0x2c59   :  { %2572 = shalt.err (!%p2569_p2)
}
0x2c5a   :  { %s2573_s25 = scalar_lea.hbm %s3022_s5, 256 }
0x2c5b   :  { %p2574_p3 = scmp.ne.s32.totalorder %s3022_s5, %s2573_s25  ;;  %p2577_p4 = scmp.lt.u32.totalorder %s2573_s25, %s3022_s5 }
0x2c5d   :  { %p2579_p5 = pnand %p2577_p4, %p2574_p3 }
0x2c5f   :  { %2582 = shalt.err (!%p2579_p5)
}
0x2c60   :  { %1858 = dma.vmem_to_hbm [thread:$0]  %s2955_s10, 256, %s3022_s5, [#allocation6], %s2617_s13, %s2617_s13, %s2618_s14   ;;  %v1843_v26 = vpop.permute.xlu1 %1842 }
0x2c61   :  { %1846 = vst.msk [vmem:[#allocation15 + $0x2] sm:$0x3] %vm188_vm1, %v1843_v26  ;;  %s2583_s8 = scalar_lea.vmem %s2959_s12, 64  ;;  %p2588_p7 = scmp.lt.s32.totalorder %s2959_s12, %s2959_s12 }
0x2c62   :  { %p2584_p6 = scmp.ne.s32.totalorder %s2959_s12, %s2583_s8  ;;  %p2589_p8 = scmp.lt.s32.totalorder %s2583_s8, %s2583_s8 }
0x2c64   :  { %p2590_p9 = por %p2589_p8, %p2588_p7 }
0x2c66   :  { %p2591_p10 = pnand %p2590_p9, %p2584_p6 }
0x2c68   :  { %2594 = shalt.err (!%p2591_p10)
}
0x2c69   :  { %s2595_s15 = scalar_lea.hbm %s3024_s7, 64 }
0x2c6a   :  { %p2596_p11 = scmp.ne.s32.totalorder %s3024_s7, %s2595_s15  ;;  %p2599_p12 = scmp.lt.u32.totalorder %s2595_s15, %s3024_s7 }
0x2c6c   :  { %p2601_p13 = pnand %p2599_p12, %p2596_p11 }
0x2c6e   :  { %2604 = shalt.err (!%p2601_p13)
}
0x2c6f   :  { %1882 = dma.vmem_to_hbm [thread:$0]  %s2959_s12, 64, %s3024_s7, [#allocation14], %s2625_s26, %s2625_s26, %s2630_s21  }
0x2c70   :  { %2611 = dma.done.wait [#allocation6], 256  }
0x2c71   :  { %2612 = vsyncadd [#allocation6], 4294967040 }
0x2c72   :  { %2613 = dma.done.wait [#allocation14], 128  }
0x2c73   :  { %2614 = vsyncadd [#allocation14], 4294967168 }
0x2c74   :  { %1892 = vsyncpa [#allocation5], 1 }
0x2c75   :  { %1893 = vsyncpa [#allocation8], 1 }
0x2c76   :  { %1894 = vsyncpa [#allocation11], 1 }
0x2c77   :  { %1895 = vsyncpa [#allocation6], 1 }
0x2c78   :  { %1896 = vsyncpa [#allocation14], 1 }

</bundles_post_ra>
